<compile_context>
chip_gen: v5e
topology: v5e:2x2
jax: 0.10.0
libtpu: 0.0.40
codegen_flags: <defaults>
</compile_context>

<pallas_src>
import functools

import jax
import jax.numpy as jnp
from jax import lax
from jax.experimental import pallas as pl
from jax.experimental.pallas import tpu as pltpu

# ----------------------------- model config ---------------------------------
BATCH = 2
SEQ = 16          # T
HIDDEN = 32       # hidden_size
VOCAB = 16        # vocab_size
NUM_LAYERS = 5
KSIZE = 3

LANE = 128
HP = LANE         # hidden padded to full lane width
VP = LANE         # vocab  padded to full lane width


def ctc_annotator_kernel(x_ref, cw_hbm, cb_ref, fw_ref, fb_ref, o_ref,
                         wbuf, sem, *, seq_len, hidden):
    """Single invocation, whole problem resident in VMEM.

    x_ref : (B*T, HP)      activations, hidden zero-padded to 128 lanes (f32)
    cw_hbm: (L, HP, HP)    packed-tap conv weights in HBM (bf16), rows
                           [0:H)=tap(t-1), [H:2H)=tap(t), [2H:3H)=tap(t+1)
    cb_ref: (L, 1, HP)     conv biases (zero-padded, f32)
    fw_ref: (HP, VP)       fc weight (zero-padded, bf16, in x out)
    fb_ref: (1, VP)        fc bias   (zero-padded, f32)
    o_ref : (B*T, VP)      lane-dense output (sliced/reshaped outside)
    wbuf  : (2, HP, HP)    bf16 VMEM double buffer for per-layer conv weights
    sem   : DMA((2,))      semaphores for the weight copies
    """
    M, Hp = x_ref.shape
    L = cb_ref.shape[0]

    # Prime layer-0 weight DMA (HBM -> VMEM slot 0) before any compute.
    pltpu.make_async_copy(cw_hbm.at[0], wbuf.at[0], sem.at[0]).start()

    h = x_ref[...].astype(jnp.float32)          # (M, HP), lanes [H:) are zero

    # Hoisted per-batch-element edge masks (reused by every layer).
    row = lax.broadcasted_iota(jnp.int32, (M, Hp), 0)
    tpos = row % seq_len
    is_first = tpos == 0                        # t == 0     within each batch
    is_last = tpos == seq_len - 1               # t == T - 1 within each batch
    zero = jnp.zeros((M, Hp), jnp.float32)

    for l in range(L):                          # statically unrolled
        slot = l & 1
        # Wait for this layer's weights; immediately prefetch the next layer's.
        pltpu.make_async_copy(cw_hbm.at[l], wbuf.at[slot], sem.at[slot]).wait()
        if l + 1 < L:
            pltpu.make_async_copy(cw_hbm.at[l + 1], wbuf.at[1 - slot],
                                  sem.at[1 - slot]).start()

        # x[t-1] / x[t+1] via cyclic sublane rolls (non-negative shifts) + masks.
        x_prev = jnp.where(is_first, zero, pltpu.roll(h, shift=1, axis=0))
        x_next = jnp.where(is_last, zero, pltpu.roll(h, shift=M - 1, axis=0))

        # Pack the 3 taps into disjoint lane ranges of ONE 128-lane operand:
        # lanes [0:H)=x_prev, [H:2H)=h, [2H:3H)=x_next, rest zero.
        cat = (x_prev
               + pltpu.roll(h, shift=hidden, axis=1)
               + pltpu.roll(x_next, shift=2 * hidden, axis=1))

        # One (M, 128) @ (128, 128) bf16 matmul per layer, f32 accumulation.
        y = jnp.dot(cat.astype(jnp.bfloat16), wbuf[slot],
                    preferred_element_type=jnp.float32)
        y = y + cb_ref[l]                       # (1, HP) broadcast over rows
        h = jnp.maximum(y, 0.0)                 # ReLU (keeps padded lanes zero)

    out = jnp.dot(h.astype(jnp.bfloat16), fw_ref[...],
                  preferred_element_type=jnp.float32) + fb_ref[...]
    o_ref[...] = out.astype(o_ref.dtype)        # unmasked lane-dense store


@jax.jit
def ctc_annotator_pallas(x, conv_w, conv_b, fc_w, fc_b):
    """x: (B,T,H); conv_w: (L,3,H,H) laid out [k, in, out]; conv_b: (L,H);
    fc_w: (H,V); fc_b: (V,).  Returns (B, T, V)."""
    B, T, H = x.shape
    L, K, _, _ = conv_w.shape
    V = fc_w.shape[1]
    M = B * T
    assert K * H <= HP and V <= VP, "tap packing needs 3*H <= 128"

    # --------- layout plumbing (wrapper only, exact zero padding) -----------
    # Batch merged onto sublanes via a free reshape; hidden lane-padded to 128.
    x_p = jnp.pad(x.reshape(M, H), ((0, 0), (0, HP - H)))

    # Packed-tap conv weights: one 128-lane contraction block per layer (bf16).
    cw = jnp.zeros((L, HP, HP), jnp.float32)
    for k in range(K):                          # rows [k*H, (k+1)*H) = tap k
        cw = cw.at[:, k * H:(k + 1) * H, :H].set(conv_w[:, k])
    cw = cw.astype(jnp.bfloat16)
    cb = jnp.zeros((L, 1, HP), jnp.float32).at[:, 0, :H].set(conv_b)
    fw = jnp.zeros((HP, VP), jnp.float32).at[:H, :V].set(fc_w).astype(jnp.bfloat16)
    fb = jnp.zeros((1, VP), jnp.float32).at[0, :V].set(fc_b)

    flops = 2 * M * (L * HP * HP + HP * VP)
    bytes_accessed = (2 * (cw.size + fw.size)               # bf16 weights
                      + 4 * (x_p.size + cb.size + fb.size + M * VP))

    kernel = functools.partial(ctc_annotator_kernel, seq_len=T, hidden=H)
    vmem = pl.BlockSpec(memory_space=pltpu.MemorySpace.VMEM)

    out_p = pl.pallas_call(
        kernel,
        out_shape=jax.ShapeDtypeStruct((M, VP), x.dtype),
        in_specs=[vmem,
                  pl.BlockSpec(memory_space=pl.ANY),   # cw stays in HBM
                  vmem, vmem, vmem],
        out_specs=vmem,
        scratch_shapes=[pltpu.VMEM((2, HP, HP), jnp.bfloat16),
                        pltpu.SemaphoreType.DMA((2,))],
        cost_estimate=pl.CostEstimate(flops=flops, transcendentals=0,
                                      bytes_accessed=bytes_accessed),
    )(x_p, cw, cb, fw, fb)
    return out_p[:, :V].reshape(B, T, V)


# ------------------------- pure-JAX reference --------------------------------
def ctc_annotator_ref(x, conv_w, conv_b, fc_w, fc_b):
    """Same math in plain JAX (f32), used only to check the kernel."""
    h = x
    T = h.shape[1]
    L = conv_w.shape[0]
    for l in range(L):
        pad = jnp.pad(h, ((0, 0), (1, 1), (0, 0)))
        y = (pad[:, 0:T] @ conv_w[l, 0]
             + pad[:, 1:T + 1] @ conv_w[l, 1]
             + pad[:, 2:T + 2] @ conv_w[l, 2]) + conv_b[l][None, None, :]
        h = jnp.maximum(y, 0.0)
    return h @ fc_w + fc_b


# ----------------------------- main -----------------------------------------
if __name__ == "__main__":
    key = jax.random.PRNGKey(0)
    k_x, k_cw, k_cb, k_fw, k_fb = jax.random.split(key, 5)

    # Deterministic synthetic parameters (shapes match nn.Conv1d / nn.Linear).
    # PyTorch Conv1d weight is (out, in, k); stored here pre-transposed to
    # (layer, k, in, out) so the kernel computes x @ W directly.
    conv_scale = 1.0 / jnp.sqrt(HIDDEN * KSIZE)
    conv_w = (jax.random.normal(k_cw, (NUM_LAYERS, KSIZE, HIDDEN, HIDDEN),
                                jnp.float32) * conv_scale)
    conv_b = (jax.random.normal(k_cb, (NUM_LAYERS, HIDDEN), jnp.float32)
              * conv_scale)

    fc_scale = 1.0 / jnp.sqrt(HIDDEN)
    fc_w = jax.random.normal(k_fw, (HIDDEN, VOCAB), jnp.float32) * fc_scale
    fc_b = jax.random.normal(k_fb, (VOCAB,), jnp.float32) * fc_scale

    x = jax.random.normal(k_x, (BATCH, SEQ, HIDDEN), jnp.float32)

    out = ctc_annotator_pallas(x, conv_w, conv_b, fc_w, fc_b)
    out = jax.block_until_ready(out)

    ref = ctc_annotator_ref(x, conv_w, conv_b, fc_w, fc_b)
    assert out.shape == (BATCH, SEQ, VOCAB), out.shape
    # bf16 MXU operands vs. f32 reference -> loosened tolerance (per review).
    assert jnp.allclose(out, ref, atol=5e-2, rtol=5e-2), "mismatch vs reference"

    print("KERNEL_OK")
</pallas_src>

<mosaic_0001>
module attributes {stable_mosaic.version = 11 : i64} {
  func.func @ctc_annotator_kernel(%arg0: memref<32x128xf32, #tpu.memory_space<vmem>>, %arg1: memref<5x128x128xbf16, #tpu.memory_space<any>>, %arg2: memref<5x1x128xf32, #tpu.memory_space<vmem>>, %arg3: memref<128x128xbf16, #tpu.memory_space<vmem>>, %arg4: memref<1x128xf32, #tpu.memory_space<vmem>>, %arg5: memref<32x128xf32, #tpu.memory_space<vmem>>, %arg6: memref<2x128x128xbf16, #tpu.memory_space<vmem>>, %arg7: memref<2x!tpu.dma_semaphore, #tpu.memory_space<semaphore_mem>>) attributes {dimension_semantics = [], scalar_prefetch = 0 : i64, scratch_operands = 2 : i64, tpu.core_type = #tpu.core_type<tc>} {
    %c0_i32 = arith.constant 0 : i32
    %c0_i32_0 = arith.constant 0 : i32
    %c0_i32_1 = arith.constant 0 : i32
    %c0_i32_2 = arith.constant 0 : i32
    %c0_i32_3 = arith.constant 0 : i32
    %0 = tpu.memref_slice %arg1[%c0_i32, %c0_i32_2, %c0_i32_3] : memref<5x128x128xbf16, #tpu.memory_space<any>> -> memref<1x128x128xbf16, #tpu.memory_space<any>>
    %1 = tpu.memref_squeeze %0 : memref<1x128x128xbf16, #tpu.memory_space<any>> -> memref<128x128xbf16, #tpu.memory_space<any>>
    %c0_i32_4 = arith.constant 0 : i32
    %c0_i32_5 = arith.constant 0 : i32
    %2 = tpu.memref_slice %arg6[%c0_i32_0, %c0_i32_4, %c0_i32_5] : memref<2x128x128xbf16, #tpu.memory_space<vmem>> -> memref<1x128x128xbf16, #tpu.memory_space<vmem>>
    %3 = tpu.memref_squeeze %2 : memref<1x128x128xbf16, #tpu.memory_space<vmem>> -> memref<128x128xbf16, #tpu.memory_space<vmem>>
    %4 = tpu.memref_slice %arg7[%c0_i32_1] : memref<2x!tpu.dma_semaphore, #tpu.memory_space<semaphore_mem>> -> memref<1x!tpu.dma_semaphore, #tpu.memory_space<semaphore_mem>>
    %5 = tpu.memref_squeeze %4 : memref<1x!tpu.dma_semaphore, #tpu.memory_space<semaphore_mem>> -> memref<!tpu.dma_semaphore, #tpu.memory_space<semaphore_mem>>
    tpu.enqueue_dma source(%1 : memref<128x128xbf16, #tpu.memory_space<any>>) target(%3 : memref<128x128xbf16, #tpu.memory_space<vmem>>) target_semaphore(%5 : memref<!tpu.dma_semaphore, #tpu.memory_space<semaphore_mem>>)
    %c0 = arith.constant 0 : index
    %c0_6 = arith.constant 0 : index
    %6 = vector.load %arg0[%c0, %c0_6] : memref<32x128xf32, #tpu.memory_space<vmem>>, vector<32x128xf32>
    %7 = tpu.iota {dimensions = array<i32: 0>} : vector<32x128xi32>
    %c16_i32 = arith.constant 16 : i32
    %c0_i32_7 = arith.constant 0 : i32
    %8 = arith.cmpi eq, %c16_i32, %c0_i32_7 : i32
    %c1_i32 = arith.constant 1 : i32
    %9 = arith.select %8, %c1_i32, %c16_i32 : i32
    %10 = vector.broadcast %9 : i32 to vector<32x128xi32>
    %11 = arith.remsi %7, %10 : vector<32x128xi32>
    %c0_i32_8 = arith.constant 0 : i32
    %12 = vector.broadcast %c0_i32_8 : i32 to vector<32x128xi32>
    %13 = arith.cmpi ne, %11, %12 : vector<32x128xi32>
    %c0_i32_9 = arith.constant 0 : i32
    %14 = vector.broadcast %c0_i32_9 : i32 to vector<32x128xi32>
    %15 = arith.cmpi slt, %11, %14 : vector<32x128xi32>
    %c0_i32_10 = arith.constant 0 : i32
    %16 = arith.cmpi slt, %9, %c0_i32_10 : i32
    %17 = vector.broadcast %16 : i1 to vector<32x128xi1>
    %18 = vector.broadcast %17 : vector<32x128xi1> to vector<32x128xi1>
    %19 = arith.xori %15, %18 : vector<32x128xi1>
    %20 = arith.andi %19, %13 : vector<32x128xi1>
    %21 = vector.broadcast %9 : i32 to vector<32x128xi32>
    %22 = arith.addi %11, %21 : vector<32x128xi32>
    %23 = arith.select %20, %22, %11 : vector<32x128xi1>, vector<32x128xi32>
    %c0_i32_11 = arith.constant 0 : i32
    %24 = vector.broadcast %c0_i32_11 : i32 to vector<32x128xi32>
    %25 = arith.cmpi eq, %23, %24 : vector<32x128xi32>
    %c15_i32 = arith.constant 15 : i32
    %26 = vector.broadcast %c15_i32 : i32 to vector<32x128xi32>
    %27 = arith.cmpi eq, %23, %26 : vector<32x128xi32>
    %cst = arith.constant 0.000000e+00 : f32
    %28 = vector.broadcast %cst : f32 to vector<32x128xf32>
    %c0_i32_12 = arith.constant 0 : i32
    %c0_i32_13 = arith.constant 0 : i32
    %c0_i32_14 = arith.constant 0 : i32
    %c0_i32_15 = arith.constant 0 : i32
    %c0_i32_16 = arith.constant 0 : i32
    %29 = tpu.memref_slice %arg1[%c0_i32_12, %c0_i32_15, %c0_i32_16] : memref<5x128x128xbf16, #tpu.memory_space<any>> -> memref<1x128x128xbf16, #tpu.memory_space<any>>
    %30 = tpu.memref_squeeze %29 : memref<1x128x128xbf16, #tpu.memory_space<any>> -> memref<128x128xbf16, #tpu.memory_space<any>>
    %c0_i32_17 = arith.constant 0 : i32
    %c0_i32_18 = arith.constant 0 : i32
    %31 = tpu.memref_slice %arg6[%c0_i32_13, %c0_i32_17, %c0_i32_18] : memref<2x128x128xbf16, #tpu.memory_space<vmem>> -> memref<1x128x128xbf16, #tpu.memory_space<vmem>>
    %32 = tpu.memref_squeeze %31 : memref<1x128x128xbf16, #tpu.memory_space<vmem>> -> memref<128x128xbf16, #tpu.memory_space<vmem>>
    %33 = tpu.memref_slice %arg7[%c0_i32_14] : memref<2x!tpu.dma_semaphore, #tpu.memory_space<semaphore_mem>> -> memref<1x!tpu.dma_semaphore, #tpu.memory_space<semaphore_mem>>
    %34 = tpu.memref_squeeze %33 : memref<1x!tpu.dma_semaphore, #tpu.memory_space<semaphore_mem>> -> memref<!tpu.dma_semaphore, #tpu.memory_space<semaphore_mem>>
    tpu.wait_dma2 semaphore(%34 : memref<!tpu.dma_semaphore, #tpu.memory_space<semaphore_mem>>) src(%30 : memref<128x128xbf16, #tpu.memory_space<any>>) dst(%32 : memref<128x128xbf16, #tpu.memory_space<vmem>>)
    %c1_i32_19 = arith.constant 1 : i32
    %c1_i32_20 = arith.constant 1 : i32
    %c1_i32_21 = arith.constant 1 : i32
    %c0_i32_22 = arith.constant 0 : i32
    %c0_i32_23 = arith.constant 0 : i32
    %35 = tpu.memref_slice %arg1[%c1_i32_19, %c0_i32_22, %c0_i32_23] : memref<5x128x128xbf16, #tpu.memory_space<any>> -> memref<1x128x128xbf16, #tpu.memory_space<any>>
    %36 = tpu.memref_squeeze %35 : memref<1x128x128xbf16, #tpu.memory_space<any>> -> memref<128x128xbf16, #tpu.memory_space<any>>
    %c0_i32_24 = arith.constant 0 : i32
    %c0_i32_25 = arith.constant 0 : i32
    %37 = tpu.memref_slice %arg6[%c1_i32_20, %c0_i32_24, %c0_i32_25] : memref<2x128x128xbf16, #tpu.memory_space<vmem>> -> memref<1x128x128xbf16, #tpu.memory_space<vmem>>
    %38 = tpu.memref_squeeze %37 : memref<1x128x128xbf16, #tpu.memory_space<vmem>> -> memref<128x128xbf16, #tpu.memory_space<vmem>>
    %39 = tpu.memref_slice %arg7[%c1_i32_21] : memref<2x!tpu.dma_semaphore, #tpu.memory_space<semaphore_mem>> -> memref<1x!tpu.dma_semaphore, #tpu.memory_space<semaphore_mem>>
    %40 = tpu.memref_squeeze %39 : memref<1x!tpu.dma_semaphore, #tpu.memory_space<semaphore_mem>> -> memref<!tpu.dma_semaphore, #tpu.memory_space<semaphore_mem>>
    tpu.enqueue_dma source(%36 : memref<128x128xbf16, #tpu.memory_space<any>>) target(%38 : memref<128x128xbf16, #tpu.memory_space<vmem>>) target_semaphore(%40 : memref<!tpu.dma_semaphore, #tpu.memory_space<semaphore_mem>>)
    %c1_i32_26 = arith.constant 1 : i32
    %41 = tpu.dynamic_rotate %6 by %c1_i32_26 dim 0 : vector<32x128xf32>, i32 -> vector<32x128xf32>
    %42 = arith.select %25, %28, %41 : vector<32x128xi1>, vector<32x128xf32>
    %c31_i32 = arith.constant 31 : i32
    %43 = tpu.dynamic_rotate %6 by %c31_i32 dim 0 : vector<32x128xf32>, i32 -> vector<32x128xf32>
    %44 = arith.select %27, %28, %43 : vector<32x128xi1>, vector<32x128xf32>
    %c32_i32 = arith.constant 32 : i32
    %45 = tpu.dynamic_rotate %6 by %c32_i32 dim 1 : vector<32x128xf32>, i32 -> vector<32x128xf32>
    %46 = arith.addf %42, %45 : vector<32x128xf32>
    %c64_i32 = arith.constant 64 : i32
    %47 = tpu.dynamic_rotate %44 by %c64_i32 dim 1 : vector<32x128xf32>, i32 -> vector<32x128xf32>
    %48 = arith.addf %46, %47 : vector<32x128xf32>
    %49 = arith.truncf %48 : vector<32x128xf32> to vector<32x128xbf16>
    %c0_27 = arith.constant 0 : index
    %c0_28 = arith.constant 0 : index
    %c0_29 = arith.constant 0 : index
    %50 = vector.load %arg6[%c0_27, %c0_28, %c0_29] : memref<2x128x128xbf16, #tpu.memory_space<vmem>>, vector<1x128x128xbf16>
    %51 = vector.shape_cast %50 : vector<1x128x128xbf16> to vector<128x128xbf16>
    %cst_30 = arith.constant dense<0.000000e+00> : vector<32x128xf32>
    %52 = tpu.matmul %49, %51, %cst_30 {dimension_numbers = #tpu.dot_dimension_numbers<[1], [0], [0], [1], [0, 0, 1, 1], [], []>} : vector<32x128xbf16>, vector<128x128xbf16>, vector<32x128xf32> -> vector<32x128xf32>
    %c0_31 = arith.constant 0 : index
    %c0_32 = arith.constant 0 : index
    %c0_33 = arith.constant 0 : index
    %53 = vector.load %arg2[%c0_31, %c0_32, %c0_33] : memref<5x1x128xf32, #tpu.memory_space<vmem>>, vector<1x1x128xf32>
    %54 = vector.shape_cast %53 : vector<1x1x128xf32> to vector<1x128xf32>
    %55 = vector.broadcast %54 : vector<1x128xf32> to vector<32x128xf32>
    %56 = arith.addf %52, %55 : vector<32x128xf32>
    %cst_34 = arith.constant 0.000000e+00 : f32
    %57 = vector.broadcast %cst_34 : f32 to vector<32x128xf32>
    %58 = arith.maximumf %56, %57 : vector<32x128xf32>
    %c1_i32_35 = arith.constant 1 : i32
    %c1_i32_36 = arith.constant 1 : i32
    %c1_i32_37 = arith.constant 1 : i32
    %c0_i32_38 = arith.constant 0 : i32
    %c0_i32_39 = arith.constant 0 : i32
    %59 = tpu.memref_slice %arg1[%c1_i32_35, %c0_i32_38, %c0_i32_39] : memref<5x128x128xbf16, #tpu.memory_space<any>> -> memref<1x128x128xbf16, #tpu.memory_space<any>>
    %60 = tpu.memref_squeeze %59 : memref<1x128x128xbf16, #tpu.memory_space<any>> -> memref<128x128xbf16, #tpu.memory_space<any>>
    %c0_i32_40 = arith.constant 0 : i32
    %c0_i32_41 = arith.constant 0 : i32
    %61 = tpu.memref_slice %arg6[%c1_i32_36, %c0_i32_40, %c0_i32_41] : memref<2x128x128xbf16, #tpu.memory_space<vmem>> -> memref<1x128x128xbf16, #tpu.memory_space<vmem>>
    %62 = tpu.memref_squeeze %61 : memref<1x128x128xbf16, #tpu.memory_space<vmem>> -> memref<128x128xbf16, #tpu.memory_space<vmem>>
    %63 = tpu.memref_slice %arg7[%c1_i32_37] : memref<2x!tpu.dma_semaphore, #tpu.memory_space<semaphore_mem>> -> memref<1x!tpu.dma_semaphore, #tpu.memory_space<semaphore_mem>>
    %64 = tpu.memref_squeeze %63 : memref<1x!tpu.dma_semaphore, #tpu.memory_space<semaphore_mem>> -> memref<!tpu.dma_semaphore, #tpu.memory_space<semaphore_mem>>
    tpu.wait_dma2 semaphore(%64 : memref<!tpu.dma_semaphore, #tpu.memory_space<semaphore_mem>>) src(%60 : memref<128x128xbf16, #tpu.memory_space<any>>) dst(%62 : memref<128x128xbf16, #tpu.memory_space<vmem>>)
    %c2_i32 = arith.constant 2 : i32
    %c0_i32_42 = arith.constant 0 : i32
    %c0_i32_43 = arith.constant 0 : i32
    %c0_i32_44 = arith.constant 0 : i32
    %c0_i32_45 = arith.constant 0 : i32
    %65 = tpu.memref_slice %arg1[%c2_i32, %c0_i32_44, %c0_i32_45] : memref<5x128x128xbf16, #tpu.memory_space<any>> -> memref<1x128x128xbf16, #tpu.memory_space<any>>
    %66 = tpu.memref_squeeze %65 : memref<1x128x128xbf16, #tpu.memory_space<any>> -> memref<128x128xbf16, #tpu.memory_space<any>>
    %c0_i32_46 = arith.constant 0 : i32
    %c0_i32_47 = arith.constant 0 : i32
    %67 = tpu.memref_slice %arg6[%c0_i32_42, %c0_i32_46, %c0_i32_47] : memref<2x128x128xbf16, #tpu.memory_space<vmem>> -> memref<1x128x128xbf16, #tpu.memory_space<vmem>>
    %68 = tpu.memref_squeeze %67 : memref<1x128x128xbf16, #tpu.memory_space<vmem>> -> memref<128x128xbf16, #tpu.memory_space<vmem>>
    %69 = tpu.memref_slice %arg7[%c0_i32_43] : memref<2x!tpu.dma_semaphore, #tpu.memory_space<semaphore_mem>> -> memref<1x!tpu.dma_semaphore, #tpu.memory_space<semaphore_mem>>
    %70 = tpu.memref_squeeze %69 : memref<1x!tpu.dma_semaphore, #tpu.memory_space<semaphore_mem>> -> memref<!tpu.dma_semaphore, #tpu.memory_space<semaphore_mem>>
    tpu.enqueue_dma source(%66 : memref<128x128xbf16, #tpu.memory_space<any>>) target(%68 : memref<128x128xbf16, #tpu.memory_space<vmem>>) target_semaphore(%70 : memref<!tpu.dma_semaphore, #tpu.memory_space<semaphore_mem>>)
    %c1_i32_48 = arith.constant 1 : i32
    %71 = tpu.dynamic_rotate %58 by %c1_i32_48 dim 0 : vector<32x128xf32>, i32 -> vector<32x128xf32>
    %72 = arith.select %25, %28, %71 : vector<32x128xi1>, vector<32x128xf32>
    %c31_i32_49 = arith.constant 31 : i32
    %73 = tpu.dynamic_rotate %58 by %c31_i32_49 dim 0 : vector<32x128xf32>, i32 -> vector<32x128xf32>
    %74 = arith.select %27, %28, %73 : vector<32x128xi1>, vector<32x128xf32>
    %c32_i32_50 = arith.constant 32 : i32
    %75 = tpu.dynamic_rotate %58 by %c32_i32_50 dim 1 : vector<32x128xf32>, i32 -> vector<32x128xf32>
    %76 = arith.addf %72, %75 : vector<32x128xf32>
    %c64_i32_51 = arith.constant 64 : i32
    %77 = tpu.dynamic_rotate %74 by %c64_i32_51 dim 1 : vector<32x128xf32>, i32 -> vector<32x128xf32>
    %78 = arith.addf %76, %77 : vector<32x128xf32>
    %79 = arith.truncf %78 : vector<32x128xf32> to vector<32x128xbf16>
    %c1 = arith.constant 1 : index
    %c0_52 = arith.constant 0 : index
    %c0_53 = arith.constant 0 : index
    %80 = vector.load %arg6[%c1, %c0_52, %c0_53] : memref<2x128x128xbf16, #tpu.memory_space<vmem>>, vector<1x128x128xbf16>
    %81 = vector.shape_cast %80 : vector<1x128x128xbf16> to vector<128x128xbf16>
    %cst_54 = arith.constant dense<0.000000e+00> : vector<32x128xf32>
    %82 = tpu.matmul %79, %81, %cst_54 {dimension_numbers = #tpu.dot_dimension_numbers<[1], [0], [0], [1], [0, 0, 1, 1], [], []>} : vector<32x128xbf16>, vector<128x128xbf16>, vector<32x128xf32> -> vector<32x128xf32>
    %c1_55 = arith.constant 1 : index
    %c0_56 = arith.constant 0 : index
    %c0_57 = arith.constant 0 : index
    %83 = vector.load %arg2[%c1_55, %c0_56, %c0_57] : memref<5x1x128xf32, #tpu.memory_space<vmem>>, vector<1x1x128xf32>
    %84 = vector.shape_cast %83 : vector<1x1x128xf32> to vector<1x128xf32>
    %85 = vector.broadcast %84 : vector<1x128xf32> to vector<32x128xf32>
    %86 = arith.addf %82, %85 : vector<32x128xf32>
    %cst_58 = arith.constant 0.000000e+00 : f32
    %87 = vector.broadcast %cst_58 : f32 to vector<32x128xf32>
    %88 = arith.maximumf %86, %87 : vector<32x128xf32>
    %c2_i32_59 = arith.constant 2 : i32
    %c0_i32_60 = arith.constant 0 : i32
    %c0_i32_61 = arith.constant 0 : i32
    %c0_i32_62 = arith.constant 0 : i32
    %c0_i32_63 = arith.constant 0 : i32
    %89 = tpu.memref_slice %arg1[%c2_i32_59, %c0_i32_62, %c0_i32_63] : memref<5x128x128xbf16, #tpu.memory_space<any>> -> memref<1x128x128xbf16, #tpu.memory_space<any>>
    %90 = tpu.memref_squeeze %89 : memref<1x128x128xbf16, #tpu.memory_space<any>> -> memref<128x128xbf16, #tpu.memory_space<any>>
    %c0_i32_64 = arith.constant 0 : i32
    %c0_i32_65 = arith.constant 0 : i32
    %91 = tpu.memref_slice %arg6[%c0_i32_60, %c0_i32_64, %c0_i32_65] : memref<2x128x128xbf16, #tpu.memory_space<vmem>> -> memref<1x128x128xbf16, #tpu.memory_space<vmem>>
    %92 = tpu.memref_squeeze %91 : memref<1x128x128xbf16, #tpu.memory_space<vmem>> -> memref<128x128xbf16, #tpu.memory_space<vmem>>
    %93 = tpu.memref_slice %arg7[%c0_i32_61] : memref<2x!tpu.dma_semaphore, #tpu.memory_space<semaphore_mem>> -> memref<1x!tpu.dma_semaphore, #tpu.memory_space<semaphore_mem>>
    %94 = tpu.memref_squeeze %93 : memref<1x!tpu.dma_semaphore, #tpu.memory_space<semaphore_mem>> -> memref<!tpu.dma_semaphore, #tpu.memory_space<semaphore_mem>>
    tpu.wait_dma2 semaphore(%94 : memref<!tpu.dma_semaphore, #tpu.memory_space<semaphore_mem>>) src(%90 : memref<128x128xbf16, #tpu.memory_space<any>>) dst(%92 : memref<128x128xbf16, #tpu.memory_space<vmem>>)
    %c3_i32 = arith.constant 3 : i32
    %c1_i32_66 = arith.constant 1 : i32
    %c1_i32_67 = arith.constant 1 : i32
    %c0_i32_68 = arith.constant 0 : i32
    %c0_i32_69 = arith.constant 0 : i32
    %95 = tpu.memref_slice %arg1[%c3_i32, %c0_i32_68, %c0_i32_69] : memref<5x128x128xbf16, #tpu.memory_space<any>> -> memref<1x128x128xbf16, #tpu.memory_space<any>>
    %96 = tpu.memref_squeeze %95 : memref<1x128x128xbf16, #tpu.memory_space<any>> -> memref<128x128xbf16, #tpu.memory_space<any>>
    %c0_i32_70 = arith.constant 0 : i32
    %c0_i32_71 = arith.constant 0 : i32
    %97 = tpu.memref_slice %arg6[%c1_i32_66, %c0_i32_70, %c0_i32_71] : memref<2x128x128xbf16, #tpu.memory_space<vmem>> -> memref<1x128x128xbf16, #tpu.memory_space<vmem>>
    %98 = tpu.memref_squeeze %97 : memref<1x128x128xbf16, #tpu.memory_space<vmem>> -> memref<128x128xbf16, #tpu.memory_space<vmem>>
    %99 = tpu.memref_slice %arg7[%c1_i32_67] : memref<2x!tpu.dma_semaphore, #tpu.memory_space<semaphore_mem>> -> memref<1x!tpu.dma_semaphore, #tpu.memory_space<semaphore_mem>>
    %100 = tpu.memref_squeeze %99 : memref<1x!tpu.dma_semaphore, #tpu.memory_space<semaphore_mem>> -> memref<!tpu.dma_semaphore, #tpu.memory_space<semaphore_mem>>
    tpu.enqueue_dma source(%96 : memref<128x128xbf16, #tpu.memory_space<any>>) target(%98 : memref<128x128xbf16, #tpu.memory_space<vmem>>) target_semaphore(%100 : memref<!tpu.dma_semaphore, #tpu.memory_space<semaphore_mem>>)
    %c1_i32_72 = arith.constant 1 : i32
    %101 = tpu.dynamic_rotate %88 by %c1_i32_72 dim 0 : vector<32x128xf32>, i32 -> vector<32x128xf32>
    %102 = arith.select %25, %28, %101 : vector<32x128xi1>, vector<32x128xf32>
    %c31_i32_73 = arith.constant 31 : i32
    %103 = tpu.dynamic_rotate %88 by %c31_i32_73 dim 0 : vector<32x128xf32>, i32 -> vector<32x128xf32>
    %104 = arith.select %27, %28, %103 : vector<32x128xi1>, vector<32x128xf32>
    %c32_i32_74 = arith.constant 32 : i32
    %105 = tpu.dynamic_rotate %88 by %c32_i32_74 dim 1 : vector<32x128xf32>, i32 -> vector<32x128xf32>
    %106 = arith.addf %102, %105 : vector<32x128xf32>
    %c64_i32_75 = arith.constant 64 : i32
    %107 = tpu.dynamic_rotate %104 by %c64_i32_75 dim 1 : vector<32x128xf32>, i32 -> vector<32x128xf32>
    %108 = arith.addf %106, %107 : vector<32x128xf32>
    %109 = arith.truncf %108 : vector<32x128xf32> to vector<32x128xbf16>
    %c0_76 = arith.constant 0 : index
    %c0_77 = arith.constant 0 : index
    %c0_78 = arith.constant 0 : index
    %110 = vector.load %arg6[%c0_76, %c0_77, %c0_78] : memref<2x128x128xbf16, #tpu.memory_space<vmem>>, vector<1x128x128xbf16>
    %111 = vector.shape_cast %110 : vector<1x128x128xbf16> to vector<128x128xbf16>
    %cst_79 = arith.constant dense<0.000000e+00> : vector<32x128xf32>
    %112 = tpu.matmul %109, %111, %cst_79 {dimension_numbers = #tpu.dot_dimension_numbers<[1], [0], [0], [1], [0, 0, 1, 1], [], []>} : vector<32x128xbf16>, vector<128x128xbf16>, vector<32x128xf32> -> vector<32x128xf32>
    %c2 = arith.constant 2 : index
    %c0_80 = arith.constant 0 : index
    %c0_81 = arith.constant 0 : index
    %113 = vector.load %arg2[%c2, %c0_80, %c0_81] : memref<5x1x128xf32, #tpu.memory_space<vmem>>, vector<1x1x128xf32>
    %114 = vector.shape_cast %113 : vector<1x1x128xf32> to vector<1x128xf32>
    %115 = vector.broadcast %114 : vector<1x128xf32> to vector<32x128xf32>
    %116 = arith.addf %112, %115 : vector<32x128xf32>
    %cst_82 = arith.constant 0.000000e+00 : f32
    %117 = vector.broadcast %cst_82 : f32 to vector<32x128xf32>
    %118 = arith.maximumf %116, %117 : vector<32x128xf32>
    %c3_i32_83 = arith.constant 3 : i32
    %c1_i32_84 = arith.constant 1 : i32
    %c1_i32_85 = arith.constant 1 : i32
    %c0_i32_86 = arith.constant 0 : i32
    %c0_i32_87 = arith.constant 0 : i32
    %119 = tpu.memref_slice %arg1[%c3_i32_83, %c0_i32_86, %c0_i32_87] : memref<5x128x128xbf16, #tpu.memory_space<any>> -> memref<1x128x128xbf16, #tpu.memory_space<any>>
    %120 = tpu.memref_squeeze %119 : memref<1x128x128xbf16, #tpu.memory_space<any>> -> memref<128x128xbf16, #tpu.memory_space<any>>
    %c0_i32_88 = arith.constant 0 : i32
    %c0_i32_89 = arith.constant 0 : i32
    %121 = tpu.memref_slice %arg6[%c1_i32_84, %c0_i32_88, %c0_i32_89] : memref<2x128x128xbf16, #tpu.memory_space<vmem>> -> memref<1x128x128xbf16, #tpu.memory_space<vmem>>
    %122 = tpu.memref_squeeze %121 : memref<1x128x128xbf16, #tpu.memory_space<vmem>> -> memref<128x128xbf16, #tpu.memory_space<vmem>>
    %123 = tpu.memref_slice %arg7[%c1_i32_85] : memref<2x!tpu.dma_semaphore, #tpu.memory_space<semaphore_mem>> -> memref<1x!tpu.dma_semaphore, #tpu.memory_space<semaphore_mem>>
    %124 = tpu.memref_squeeze %123 : memref<1x!tpu.dma_semaphore, #tpu.memory_space<semaphore_mem>> -> memref<!tpu.dma_semaphore, #tpu.memory_space<semaphore_mem>>
    tpu.wait_dma2 semaphore(%124 : memref<!tpu.dma_semaphore, #tpu.memory_space<semaphore_mem>>) src(%120 : memref<128x128xbf16, #tpu.memory_space<any>>) dst(%122 : memref<128x128xbf16, #tpu.memory_space<vmem>>)
    %c4_i32 = arith.constant 4 : i32
    %c0_i32_90 = arith.constant 0 : i32
    %c0_i32_91 = arith.constant 0 : i32
    %c0_i32_92 = arith.constant 0 : i32
    %c0_i32_93 = arith.constant 0 : i32
    %125 = tpu.memref_slice %arg1[%c4_i32, %c0_i32_92, %c0_i32_93] : memref<5x128x128xbf16, #tpu.memory_space<any>> -> memref<1x128x128xbf16, #tpu.memory_space<any>>
    %126 = tpu.memref_squeeze %125 : memref<1x128x128xbf16, #tpu.memory_space<any>> -> memref<128x128xbf16, #tpu.memory_space<any>>
    %c0_i32_94 = arith.constant 0 : i32
    %c0_i32_95 = arith.constant 0 : i32
    %127 = tpu.memref_slice %arg6[%c0_i32_90, %c0_i32_94, %c0_i32_95] : memref<2x128x128xbf16, #tpu.memory_space<vmem>> -> memref<1x128x128xbf16, #tpu.memory_space<vmem>>
    %128 = tpu.memref_squeeze %127 : memref<1x128x128xbf16, #tpu.memory_space<vmem>> -> memref<128x128xbf16, #tpu.memory_space<vmem>>
    %129 = tpu.memref_slice %arg7[%c0_i32_91] : memref<2x!tpu.dma_semaphore, #tpu.memory_space<semaphore_mem>> -> memref<1x!tpu.dma_semaphore, #tpu.memory_space<semaphore_mem>>
    %130 = tpu.memref_squeeze %129 : memref<1x!tpu.dma_semaphore, #tpu.memory_space<semaphore_mem>> -> memref<!tpu.dma_semaphore, #tpu.memory_space<semaphore_mem>>
    tpu.enqueue_dma source(%126 : memref<128x128xbf16, #tpu.memory_space<any>>) target(%128 : memref<128x128xbf16, #tpu.memory_space<vmem>>) target_semaphore(%130 : memref<!tpu.dma_semaphore, #tpu.memory_space<semaphore_mem>>)
    %c1_i32_96 = arith.constant 1 : i32
    %131 = tpu.dynamic_rotate %118 by %c1_i32_96 dim 0 : vector<32x128xf32>, i32 -> vector<32x128xf32>
    %132 = arith.select %25, %28, %131 : vector<32x128xi1>, vector<32x128xf32>
    %c31_i32_97 = arith.constant 31 : i32
    %133 = tpu.dynamic_rotate %118 by %c31_i32_97 dim 0 : vector<32x128xf32>, i32 -> vector<32x128xf32>
    %134 = arith.select %27, %28, %133 : vector<32x128xi1>, vector<32x128xf32>
    %c32_i32_98 = arith.constant 32 : i32
    %135 = tpu.dynamic_rotate %118 by %c32_i32_98 dim 1 : vector<32x128xf32>, i32 -> vector<32x128xf32>
    %136 = arith.addf %132, %135 : vector<32x128xf32>
    %c64_i32_99 = arith.constant 64 : i32
    %137 = tpu.dynamic_rotate %134 by %c64_i32_99 dim 1 : vector<32x128xf32>, i32 -> vector<32x128xf32>
    %138 = arith.addf %136, %137 : vector<32x128xf32>
    %139 = arith.truncf %138 : vector<32x128xf32> to vector<32x128xbf16>
    %c1_100 = arith.constant 1 : index
    %c0_101 = arith.constant 0 : index
    %c0_102 = arith.constant 0 : index
    %140 = vector.load %arg6[%c1_100, %c0_101, %c0_102] : memref<2x128x128xbf16, #tpu.memory_space<vmem>>, vector<1x128x128xbf16>
    %141 = vector.shape_cast %140 : vector<1x128x128xbf16> to vector<128x128xbf16>
    %cst_103 = arith.constant dense<0.000000e+00> : vector<32x128xf32>
    %142 = tpu.matmul %139, %141, %cst_103 {dimension_numbers = #tpu.dot_dimension_numbers<[1], [0], [0], [1], [0, 0, 1, 1], [], []>} : vector<32x128xbf16>, vector<128x128xbf16>, vector<32x128xf32> -> vector<32x128xf32>
    %c3 = arith.constant 3 : index
    %c0_104 = arith.constant 0 : index
    %c0_105 = arith.constant 0 : index
    %143 = vector.load %arg2[%c3, %c0_104, %c0_105] : memref<5x1x128xf32, #tpu.memory_space<vmem>>, vector<1x1x128xf32>
    %144 = vector.shape_cast %143 : vector<1x1x128xf32> to vector<1x128xf32>
    %145 = vector.broadcast %144 : vector<1x128xf32> to vector<32x128xf32>
    %146 = arith.addf %142, %145 : vector<32x128xf32>
    %cst_106 = arith.constant 0.000000e+00 : f32
    %147 = vector.broadcast %cst_106 : f32 to vector<32x128xf32>
    %148 = arith.maximumf %146, %147 : vector<32x128xf32>
    %c4_i32_107 = arith.constant 4 : i32
    %c0_i32_108 = arith.constant 0 : i32
    %c0_i32_109 = arith.constant 0 : i32
    %c0_i32_110 = arith.constant 0 : i32
    %c0_i32_111 = arith.constant 0 : i32
    %149 = tpu.memref_slice %arg1[%c4_i32_107, %c0_i32_110, %c0_i32_111] : memref<5x128x128xbf16, #tpu.memory_space<any>> -> memref<1x128x128xbf16, #tpu.memory_space<any>>
    %150 = tpu.memref_squeeze %149 : memref<1x128x128xbf16, #tpu.memory_space<any>> -> memref<128x128xbf16, #tpu.memory_space<any>>
    %c0_i32_112 = arith.constant 0 : i32
    %c0_i32_113 = arith.constant 0 : i32
    %151 = tpu.memref_slice %arg6[%c0_i32_108, %c0_i32_112, %c0_i32_113] : memref<2x128x128xbf16, #tpu.memory_space<vmem>> -> memref<1x128x128xbf16, #tpu.memory_space<vmem>>
    %152 = tpu.memref_squeeze %151 : memref<1x128x128xbf16, #tpu.memory_space<vmem>> -> memref<128x128xbf16, #tpu.memory_space<vmem>>
    %153 = tpu.memref_slice %arg7[%c0_i32_109] : memref<2x!tpu.dma_semaphore, #tpu.memory_space<semaphore_mem>> -> memref<1x!tpu.dma_semaphore, #tpu.memory_space<semaphore_mem>>
    %154 = tpu.memref_squeeze %153 : memref<1x!tpu.dma_semaphore, #tpu.memory_space<semaphore_mem>> -> memref<!tpu.dma_semaphore, #tpu.memory_space<semaphore_mem>>
    tpu.wait_dma2 semaphore(%154 : memref<!tpu.dma_semaphore, #tpu.memory_space<semaphore_mem>>) src(%150 : memref<128x128xbf16, #tpu.memory_space<any>>) dst(%152 : memref<128x128xbf16, #tpu.memory_space<vmem>>)
    %c1_i32_114 = arith.constant 1 : i32
    %155 = tpu.dynamic_rotate %148 by %c1_i32_114 dim 0 : vector<32x128xf32>, i32 -> vector<32x128xf32>
    %156 = arith.select %25, %28, %155 : vector<32x128xi1>, vector<32x128xf32>
    %c31_i32_115 = arith.constant 31 : i32
    %157 = tpu.dynamic_rotate %148 by %c31_i32_115 dim 0 : vector<32x128xf32>, i32 -> vector<32x128xf32>
    %158 = arith.select %27, %28, %157 : vector<32x128xi1>, vector<32x128xf32>
    %c32_i32_116 = arith.constant 32 : i32
    %159 = tpu.dynamic_rotate %148 by %c32_i32_116 dim 1 : vector<32x128xf32>, i32 -> vector<32x128xf32>
    %160 = arith.addf %156, %159 : vector<32x128xf32>
    %c64_i32_117 = arith.constant 64 : i32
    %161 = tpu.dynamic_rotate %158 by %c64_i32_117 dim 1 : vector<32x128xf32>, i32 -> vector<32x128xf32>
    %162 = arith.addf %160, %161 : vector<32x128xf32>
    %163 = arith.truncf %162 : vector<32x128xf32> to vector<32x128xbf16>
    %c0_118 = arith.constant 0 : index
    %c0_119 = arith.constant 0 : index
    %c0_120 = arith.constant 0 : index
    %164 = vector.load %arg6[%c0_118, %c0_119, %c0_120] : memref<2x128x128xbf16, #tpu.memory_space<vmem>>, vector<1x128x128xbf16>
    %165 = vector.shape_cast %164 : vector<1x128x128xbf16> to vector<128x128xbf16>
    %cst_121 = arith.constant dense<0.000000e+00> : vector<32x128xf32>
    %166 = tpu.matmul %163, %165, %cst_121 {dimension_numbers = #tpu.dot_dimension_numbers<[1], [0], [0], [1], [0, 0, 1, 1], [], []>} : vector<32x128xbf16>, vector<128x128xbf16>, vector<32x128xf32> -> vector<32x128xf32>
    %c4 = arith.constant 4 : index
    %c0_122 = arith.constant 0 : index
    %c0_123 = arith.constant 0 : index
    %167 = vector.load %arg2[%c4, %c0_122, %c0_123] : memref<5x1x128xf32, #tpu.memory_space<vmem>>, vector<1x1x128xf32>
    %168 = vector.shape_cast %167 : vector<1x1x128xf32> to vector<1x128xf32>
    %169 = vector.broadcast %168 : vector<1x128xf32> to vector<32x128xf32>
    %170 = arith.addf %166, %169 : vector<32x128xf32>
    %cst_124 = arith.constant 0.000000e+00 : f32
    %171 = vector.broadcast %cst_124 : f32 to vector<32x128xf32>
    %172 = arith.maximumf %170, %171 : vector<32x128xf32>
    %173 = arith.truncf %172 : vector<32x128xf32> to vector<32x128xbf16>
    %c0_125 = arith.constant 0 : index
    %c0_126 = arith.constant 0 : index
    %174 = vector.load %arg3[%c0_125, %c0_126] : memref<128x128xbf16, #tpu.memory_space<vmem>>, vector<128x128xbf16>
    %cst_127 = arith.constant dense<0.000000e+00> : vector<32x128xf32>
    %175 = tpu.matmul %173, %174, %cst_127 {dimension_numbers = #tpu.dot_dimension_numbers<[1], [0], [0], [1], [0, 0, 1, 1], [], []>} : vector<32x128xbf16>, vector<128x128xbf16>, vector<32x128xf32> -> vector<32x128xf32>
    %c0_128 = arith.constant 0 : index
    %c0_129 = arith.constant 0 : index
    %176 = vector.load %arg4[%c0_128, %c0_129] : memref<1x128xf32, #tpu.memory_space<vmem>>, vector<1x128xf32>
    %177 = vector.broadcast %176 : vector<1x128xf32> to vector<32x128xf32>
    %178 = arith.addf %175, %177 : vector<32x128xf32>
    %c0_130 = arith.constant 0 : index
    %c0_131 = arith.constant 0 : index
    %179 = vector.load %arg5[%c0_130, %c0_131] : memref<32x128xf32, #tpu.memory_space<vmem>>, vector<32x128xf32>
    tpu.vector_store %arg5[%c0_130, %c0_131], %178 {strides = array<i32>} : memref<32x128xf32, #tpu.memory_space<vmem>>, vector<32x128xf32>,
    return
  }
}

</mosaic_0001>

<bundles_post_ra>
// kernel: ctc_annotator_pallas.1
= control target key start
LH: loop header
LB: loop body
LE: loop exit
PB: predicated region body
PF: predicated region fallthrough
CT: control target
= control target key end

     0   :  { %10 = vsyncpa [#allocation5], 0  ;;  %s1954_s0 = inlined_call_operand.vmem [shape: f32[32,128], index: 0, kind: input, shape index: {}]   ;;  %s1955_s1 = inlined_call_operand.vmem [shape: bf16[5,128,128], index: 1, kind: input, shape index: {}]   ;;  %s1956_s2 = inlined_call_operand.vmem [shape: f32[5,1,128], index: 2, kind: input, shape index: {}]   ;;  %s1957_s3 = inlined_call_operand.vmem [shape: bf16[128,128], index: 3, kind: input, shape index: {}]   ;;  %s1958_s4 = inlined_call_operand.vmem [shape: f32[1,128], index: 4, kind: input, shape index: {}]   ;;  %s1959_s5 = inlined_call_operand.hbm [shape: f32[32,128], index: 5, kind: output, shape index: {}]  }
   0x1   :  { %v29_v0 = vld [vmem:[%s1955_s1] sm:$0xff]  ;;  %v31_v1 = vld [vmem:[%s1955_s1 + $0x8] sm:$0xff]  ;;  %v33_v2 = vld [vmem:[%s1955_s1 + $0x10] sm:$0xff] }
   0x2   :  { %30 = vst [vmem:[#allocation2 + $0x30] sm:$0xff] %v29_v0  ;;  %v35_v3 = vld [vmem:[%s1955_s1 + $0x18] sm:$0xff]  ;;  %v37_v4 = vld [vmem:[%s1955_s1 + $0x20] sm:$0xff]  ;;  %v39_v5 = vld [vmem:[%s1955_s1 + $0x28] sm:$0xff] }
   0x3   :  { %32 = vst [vmem:[#allocation2] sm:$0xff] %v31_v1  ;;  %v41_v6 = vld [vmem:[%s1955_s1 + $0x30] sm:$0xff]  ;;  %v43_v7 = vld [vmem:[%s1955_s1 + $0x38] sm:$0xff] }
   0x4   :  { %34 = vst [vmem:[#allocation2 + $0x58] sm:$0xff] %v33_v2 }
   0x5   :  { %36 = vst [vmem:[#allocation2 + $0x18] sm:$0xff] %v35_v3 }
   0x6   :  { %38 = vst [vmem:[#allocation2 + $0x50] sm:$0xff] %v37_v4 }
   0x7   :  { %40 = vst [vmem:[#allocation2 + $0x68] sm:$0xff] %v39_v5 }
   0x8   :  { %42 = vst [vmem:[#allocation2 + $0x8] sm:$0xff] %v41_v6 }
   0x9   :  { %44 = vst [vmem:[#allocation2 + $0x48] sm:$0xff] %v43_v7 }
   0xa   :  { %50 = vsyncadd [#allocation3], 1024  ;;  %v1520_v8 = vld [vmem:[%s1954_s0] sm:$0xff]  ;;  %v1525_v9 = vld [vmem:[%s1954_s0 + $0x8] sm:$0xff]  ;;  %v55_v10 = vlaneseq }
   0xb   :  { %v1530_v11 = vld [vmem:[%s1954_s0 + $0x10] sm:$0xff]  ;;  %v1535_v12 = vld [vmem:[%s1954_s0 + $0x18] sm:$0xff] }
   0xc   :  { %v1537_v13 = vshrl.u32 %v55_v10, 7 }
   0xe   :  { %v57_v14 = vadd.s32 8, %v1537_v13  ;;  %v58_v15 = vadd.s32 16, %v1537_v13  ;;  %v59_v16 = vadd.s32 24, %v1537_v13  ;;  %v64_v17 = vand.u32 15, %v1537_v13 }
  0x10   :  { %v71_v18 = vand.u32 15, %v57_v14  ;;  %v78_v19 = vand.u32 15, %v58_v15  ;;  %v85_v20 = vand.u32 15, %v59_v16  ;;  %vm1543_vm0 = vcmp.eq.s32.totalorder %v64_v17, 0 }
  0x12   :  { %vm1547_vm1 = vcmp.eq.s32.totalorder %v78_v19, 0  ;;  %vm1551_vm2 = vcmp.eq.s32.totalorder %v71_v18, 15  ;;  %vm1555_vm3 = vcmp.eq.s32.totalorder %v85_v20, 15 }
  0x13   :  { %1446 = dma.done.wait [#allocation3], 1024 }
  0x14   :  { %1447 = vsyncadd [#allocation3], 4294966272  ;;  %v1117_v25 = vld [vmem:[%s1955_s1 + $0x40] sm:$0xff]  ;;  %v1118_v26 = vld [vmem:[%s1955_s1 + $0x48] sm:$0xff]  ;;  %v168_v33 = vrot.slane %v1520_v8, 1  ;;  %v169_v34 = vrot.slane %v1525_v9, 1 }
  0x15   :  { %v1119_v27 = vld [vmem:[%s1955_s1 + $0x50] sm:$0xff]  ;;  %134 = vst [vmem:[#allocation2 + $0x40] sm:$0xff] %v1117_v25  ;;  %v1120_v28 = vld [vmem:[%s1955_s1 + $0x58] sm:$0xff]  ;;  %v1121_v29 = vld [vmem:[%s1955_s1 + $0x60] sm:$0xff]  ;;  %vm172_vm4 = vcmp.lt.s32.totalorder %v1537_v13, 7  ;;  %s1458_s7 = smov 32  }
  0x16   :  { %136 = vst [vmem:[#allocation2 + $0x20] sm:$0xff] %v1118_v26  ;;  %v1122_v30 = vld [vmem:[%s1955_s1 + $0x68] sm:$0xff]  ;;  %v1123_v31 = vld [vmem:[%s1955_s1 + $0x70] sm:$0xff]  ;;  %v1124_v32 = vld [vmem:[%s1955_s1 + $0x78] sm:$0xff]  ;;  %181 = vrot.lane.b32.xlu0 %v1520_v8, %s1458_s7  ;;  %v170_v35 = vrot.slane %v1530_v11, 1 }
  0x17   :  { %138 = vst [vmem:[#allocation2 + $0x10] sm:$0xff] %v1119_v27  ;;  %185 = vrot.lane.b32.xlu2 %v1530_v11, %s1458_s7 }
  0x18   :  { %140 = vst [vmem:[#allocation2 + $0x38] sm:$0xff] %v1120_v28 }
  0x19   :  { %142 = vst [vmem:[#allocation2 + $0x60] sm:$0xff] %v1121_v29 }
  0x1a   :  { %144 = vst [vmem:[#allocation2 + $0x70] sm:$0xff] %v1122_v30 }
  0x1b   :  { %146 = vst [vmem:[#allocation2 + $0x78] sm:$0xff] %v1123_v31 }
  0x1c   :  { %148 = vst [vmem:[#allocation2 + $0x28] sm:$0xff] %v1124_v32 }
  0x1d   :  { %154 = vsyncadd [#allocation3 + $0x1], 1024  ;;  %v1354_v36 = vld [vmem:[#allocation2 + $0x48] sm:$0xff]  ;;  %v175_v37 = vsel %vm172_vm4, %v168_v33, %v169_v34  ;;  %s1459_s8 = smov 64   ;;  %v174_v39 = vsel %vm172_vm4, %v169_v34, %v170_v35  ;;  %v171_v42 = vrot.slane %v1535_v12, 1  ;;  %v1351_v43 = vld [vmem:[#allocation2 + $0x50] sm:$0xff] }
  0x1e   :  { %193 = vrot.lane.b32.xlu1 %v175_v37, %s1459_s8  ;;  %275 = vmatpush.bf16.msra.mxu0 %v1354_v36  ;;  %v1353_v38 = vld [vmem:[#allocation2 + $0x8] sm:$0xff]  ;;  %v178_v41 = vsel %vm1551_vm2, 0.0, %v174_v39  ;;  %v1350_v46 = vld [vmem:[#allocation2 + $0x18] sm:$0xff]  ;;  %v1348_v49 = vld [vmem:[#allocation2] sm:$0xff]  ;;  %v155_v51 = vrot.slane %v1520_v8, 7  ;;  %v158_v52 = vrot.slane %v1535_v12, 7 }
  0x1f   :  { %v1352_v40 = vld [vmem:[#allocation2 + $0x68] sm:$0xff]  ;;  %183 = vrot.lane.b32.xlu0 %v1525_v9, %s1458_s7  ;;  %187 = vrot.lane.b32.xlu2 %v1535_v12, %s1458_s7  ;;  %v176_v44 = vsel %vm172_vm4, %v171_v42, %v168_v33  ;;  %v173_v45 = vsel %vm172_vm4, %v170_v35, %v171_v42  ;;  %v1349_v48 = vld [vmem:[#allocation2 + $0x58] sm:$0xff]  ;;  %v1347_v50 = vld [vmem:[#allocation2 + $0x30] sm:$0xff]  ;;  %vm159_vm5 = vcmp.lt.s32.totalorder %v1537_v13, 1  ;;  %v156_v56 = vrot.slane %v1525_v9, 7 }
  0x20   :  { %v180_v47 = vsel %vm1555_vm3, 0.0, %v176_v44  ;;  %v163_v54 = vsel %vm159_vm5, %v158_v52, %v155_v51  ;;  %v157_v1 = vrot.slane %v1530_v11, 7  ;;  %v1416_v16 = vld [vmem:[%s1956_s2] ss:$0 sm:$0xff] }
  0x21   :  { %v164_v57 = vsel %vm1543_vm0, 0.0, %v163_v54  ;;  %v162_v58 = vsel %vm159_vm5, %v155_v51, %v156_v56 }
  0x22   :  { %276 = vmatpush.bf16.msra.mxu0 %v1353_v38  ;;  %v161_v4 = vsel %vm159_vm5, %v156_v56, %v157_v1  ;;  %v160_v7 = vsel %vm159_vm5, %v157_v1, %v158_v52 }
  0x23   :  { %v166_v5 = vsel %vm1547_vm1, 0.0, %v161_v4 }
  0x26   :  { %195 = vrot.lane.b32.xlu1 %v178_v41, %s1459_s8  ;;  %277 = vmatpush.bf16.msra.mxu0 %v1352_v40 }
  0x27   :  { %197 = vrot.lane.b32.xlu0 %v173_v45, %s1459_s8 }
  0x2a   :  { %278 = vmatpush.bf16.msra.mxu0 %v1351_v43 }
  0x2e   :  { %199 = vrot.lane.b32.xlu1 %v180_v47, %s1459_s8  ;;  %279 = vmatpush.bf16.msra.mxu0 %v1350_v46 }
  0x32   :  { %280 = vmatpush.bf16.msra.mxu0 %v1349_v48 }
  0x36   :  { %281 = vmatpush.bf16.msra.mxu0 %v1348_v49 }
  0x3a   :  { %282 = vmatpush.bf16.msra.mxu0 %v1347_v50 }
  0x71   :  { %v186_v60 = vpop.permute.xlu2 %185 }
  0x72   :  { %v191_v8 = vadd.f32 %v186_v60, %v166_v5 }
  0x79   :  { %v188_v6 = vpop.permute.xlu2 %187 }
  0x7a   :  { %v192_v9 = vadd.f32 %v188_v6, %v160_v7 }
  0x88   :  { %v182_v53 = vpop.permute.xlu0 %181 }
  0x89   :  { %v189_v59 = vadd.f32 %v182_v53, %v164_v57 }
  0x90   :  { %v194_v55 = vpop.permute.xlu1 %193 }
  0x91   :  { %v184_v61 = vpop.permute.xlu0 %183  ;;  %v201_v0 = vadd.f32 %v194_v55, %v189_v59 }
  0x92   :  { %v190_v62 = vadd.f32 %v184_v61, %v162_v58 }
  0x98   :  { %v196_v63 = vpop.permute.xlu1 %195 }
  0x99   :  { %v202_v2 = vadd.f32 %v196_v63, %v190_v62  ;;  %v198_v10 = vpop.permute.xlu0 %197 }
  0x9a   :  { %v203_v14 = vadd.f32 %v198_v10, %v191_v8 }
  0x9b   :  { %v205_v3 = vpack.c.bf16 %v202_v2, %v201_v0 }
  0x9d   :  { %283 = vmatmul.bf16.vlgmr.msra.gmra.mxu0 %v205_v3 }
  0xa0   :  { %v200_v12 = vpop.permute.xlu1 %199 }
  0xa1   :  { %v204_v15 = vadd.f32 %v200_v12, %v192_v9 }
  0xa3   :  { %v206_v11 = vpack.c.bf16 %v204_v15, %v203_v14 }
  0xad   :  { %288 = vmatmul.bf16.gmra.mxu0 %v206_v11 }
 0x11a   :  { %v284_v17 = vpop.f32.mrf.mxu0 }
 0x11b   :  { %v285_v18 = vadd.f32 %v1416_v16, %v284_v17 }
 0x11d   :  { %v1632_v19 = vmax.f32 %v285_v18, 0.0 }
 0x122   :  { %v286_v20 = vpop.f32.mrf.mxu0 }
 0x123   :  { %v287_v25 = vadd.f32 %v1416_v16, %v286_v20 }
 0x125   :  { %v1634_v26 = vmax.f32 %v287_v25, 0.0 }
 0x12a   :  { %v289_v27 = vpop.f32.mrf.mxu0 }
 0x12b   :  { %v290_v28 = vadd.f32 %v1416_v16, %v289_v27 }
 0x12d   :  { %v1636_v29 = vmax.f32 %v290_v28, 0.0 }
 0x132   :  { %v291_v30 = vpop.f32.mrf.mxu0 }
 0x133   :  { %v292_v31 = vadd.f32 %v1416_v16, %v291_v30 }
 0x135   :  { %v1638_v32 = vmax.f32 %v292_v31, 0.0 }
 0x136   :  { %1448 = dma.done.wait [#allocation3 + $0x1], 1024 }
 0x137   :  { %1449 = vsyncadd [#allocation3 + $0x1], 4294966272  ;;  %v1157_v33 = vld [vmem:[%s1955_s1 + $0x80] sm:$0xff]  ;;  %v1158_v34 = vld [vmem:[%s1955_s1 + $0x88] sm:$0xff]  ;;  %357 = vrot.lane.b32.xlu0 %v1632_v19, %s1458_s7  ;;  %v345_v41 = vrot.slane %v1632_v19, 1  ;;  %v346_v42 = vrot.slane %v1634_v26, 1  ;;  %361 = vrot.lane.b32.xlu2 %v1636_v29, %s1458_s7 }
 0x138   :  { %v1159_v35 = vld [vmem:[%s1955_s1 + $0x90] sm:$0xff]  ;;  %312 = vst [vmem:[#allocation2 + $0x30] sm:$0xff] %v1157_v33  ;;  %v1160_v36 = vld [vmem:[%s1955_s1 + $0x98] sm:$0xff]  ;;  %v1161_v37 = vld [vmem:[%s1955_s1 + $0xa0] sm:$0xff] }
 0x139   :  { %314 = vst [vmem:[#allocation2] sm:$0xff] %v1158_v34  ;;  %v1162_v38 = vld [vmem:[%s1955_s1 + $0xa8] sm:$0xff]  ;;  %v1163_v39 = vld [vmem:[%s1955_s1 + $0xb0] sm:$0xff]  ;;  %v1164_v40 = vld [vmem:[%s1955_s1 + $0xb8] sm:$0xff] }
 0x13a   :  { %316 = vst [vmem:[#allocation2 + $0x58] sm:$0xff] %v1159_v35 }
 0x13b   :  { %318 = vst [vmem:[#allocation2 + $0x18] sm:$0xff] %v1160_v36 }
 0x13c   :  { %320 = vst [vmem:[#allocation2 + $0x50] sm:$0xff] %v1161_v37 }
 0x13d   :  { %322 = vst [vmem:[#allocation2 + $0x68] sm:$0xff] %v1162_v38 }
 0x13e   :  { %324 = vst [vmem:[#allocation2 + $0x8] sm:$0xff] %v1163_v39 }
 0x13f   :  { %326 = vst [vmem:[#allocation2 + $0x48] sm:$0xff] %v1164_v40 }
 0x140   :  { %332 = vsyncadd [#allocation3], 1024  ;;  %v347_v43 = vrot.slane %v1636_v29, 1  ;;  %v1362_v44 = vld [vmem:[#allocation2 + $0x28] sm:$0xff]  ;;  %v351_v45 = vsel %vm172_vm4, %v345_v41, %v346_v42  ;;  %v1361_v46 = vld [vmem:[#allocation2 + $0x78] sm:$0xff]  ;;  %359 = vrot.lane.b32.xlu0 %v1634_v26, %s1458_s7  ;;  %363 = vrot.lane.b32.xlu2 %v1638_v32, %s1458_s7  ;;  %v348_v50 = vrot.slane %v1638_v32, 1 }
 0x141   :  { %369 = vrot.lane.b32.xlu1 %v351_v45, %s1459_s8  ;;  %452 = vmatpush.bf16.msra.mxu1 %v1362_v44  ;;  %v1360_v48 = vld [vmem:[#allocation2 + $0x70] sm:$0xff]  ;;  %v1359_v51 = vld [vmem:[#allocation2 + $0x60] sm:$0xff]  ;;  %v1358_v55 = vld [vmem:[#allocation2 + $0x38] sm:$0xff]  ;;  %v333_v59 = vrot.slane %v1632_v19, 7  ;;  %v336_v60 = vrot.slane %v1638_v32, 7  ;;  %v334_v63 = vrot.slane %v1634_v26, 7 }
 0x142   :  { %v350_v47 = vsel %vm172_vm4, %v346_v42, %v347_v43  ;;  %v349_v52 = vsel %vm172_vm4, %v347_v43, %v348_v50  ;;  %v352_v53 = vsel %vm172_vm4, %v348_v50, %v345_v41  ;;  %v1357_v56 = vld [vmem:[#allocation2 + $0x10] sm:$0xff]  ;;  %v1356_v57 = vld [vmem:[#allocation2 + $0x20] sm:$0xff]  ;;  %v335_v9 = vrot.slane %v1636_v29, 7 }
 0x143   :  { %v354_v49 = vsel %vm1551_vm2, 0.0, %v350_v47  ;;  %v356_v54 = vsel %vm1555_vm3, 0.0, %v352_v53  ;;  %v1355_v58 = vld [vmem:[#allocation2 + $0x40] sm:$0xff]  ;;  %v340_v62 = vsel %vm159_vm5, %v336_v60, %v333_v59  ;;  %v339_v2 = vsel %vm159_vm5, %v333_v59, %v334_v63 }
 0x144   :  { %v341_v1 = vsel %vm1543_vm0, 0.0, %v340_v62  ;;  %v338_v14 = vsel %vm159_vm5, %v334_v63, %v335_v9  ;;  %v337_v16 = vsel %vm159_vm5, %v335_v9, %v336_v60  ;;  %v1417_v28 = vld [vmem:[%s1956_s2 + $0x1] ss:$0 sm:$0xff] }
 0x145   :  { %453 = vmatpush.bf16.msra.mxu1 %v1361_v46  ;;  %v343_v15 = vsel %vm1547_vm1, 0.0, %v338_v14 }
 0x148   :  { %373 = vrot.lane.b32.xlu0 %v349_v52, %s1459_s8 }
 0x149   :  { %371 = vrot.lane.b32.xlu1 %v354_v49, %s1459_s8  ;;  %454 = vmatpush.bf16.msra.mxu1 %v1360_v48 }
 0x14d   :  { %455 = vmatpush.bf16.msra.mxu1 %v1359_v51 }
 0x151   :  { %375 = vrot.lane.b32.xlu1 %v356_v54, %s1459_s8  ;;  %456 = vmatpush.bf16.msra.mxu1 %v1358_v55 }
 0x155   :  { %457 = vmatpush.bf16.msra.mxu1 %v1357_v56 }
 0x159   :  { %458 = vmatpush.bf16.msra.mxu1 %v1356_v57 }
 0x15d   :  { %459 = vmatpush.bf16.msra.mxu1 %v1355_v58 }
 0x191   :  { %v362_v5 = vpop.permute.xlu2 %361 }
 0x192   :  { %v367_v17 = vadd.f32 %v362_v5, %v343_v15 }
 0x19a   :  { %v364_v11 = vpop.permute.xlu2 %363 }
 0x19b   :  { %v368_v18 = vadd.f32 %v364_v11, %v337_v16 }
 0x1a9   :  { %v358_v61 = vpop.permute.xlu0 %357 }
 0x1aa   :  { %v365_v3 = vadd.f32 %v358_v61, %v341_v1 }
 0x1b2   :  { %v360_v4 = vpop.permute.xlu0 %359 }
 0x1b3   :  { %v370_v0 = vpop.permute.xlu1 %369  ;;  %v366_v6 = vadd.f32 %v360_v4, %v339_v2 }
 0x1b4   :  { %v377_v8 = vadd.f32 %v370_v0, %v365_v3 }
 0x1ba   :  { %v374_v19 = vpop.permute.xlu0 %373 }
 0x1bb   :  { %v372_v7 = vpop.permute.xlu1 %371  ;;  %v379_v25 = vadd.f32 %v374_v19, %v367_v17 }
 0x1bc   :  { %v378_v10 = vadd.f32 %v372_v7, %v366_v6 }
 0x1be   :  { %v381_v12 = vpack.c.bf16 %v378_v10, %v377_v8 }
 0x1c0   :  { %460 = vmatmul.bf16.vlgmr.msra.gmra.mxu1 %v381_v12 }
 0x1c3   :  { %v376_v20 = vpop.permute.xlu1 %375 }
 0x1c4   :  { %v380_v26 = vadd.f32 %v376_v20, %v368_v18 }
 0x1c6   :  { %v382_v27 = vpack.c.bf16 %v380_v26, %v379_v25 }
 0x1d0   :  { %465 = vmatmul.bf16.gmra.mxu1 %v382_v27 }
 0x23d   :  { %v461_v29 = vpop.f32.mrf.mxu1 }
 0x23e   :  { %v462_v30 = vadd.f32 %v1417_v28, %v461_v29 }
 0x240   :  { %v1711_v31 = vmax.f32 %v462_v30, 0.0 }
 0x245   :  { %v463_v32 = vpop.f32.mrf.mxu1 }
 0x246   :  { %v464_v33 = vadd.f32 %v1417_v28, %v463_v32 }
 0x248   :  { %v1713_v34 = vmax.f32 %v464_v33, 0.0 }
 0x24d   :  { %v466_v35 = vpop.f32.mrf.mxu1 }
 0x24e   :  { %v467_v36 = vadd.f32 %v1417_v28, %v466_v35 }
 0x250   :  { %v1715_v37 = vmax.f32 %v467_v36, 0.0 }
 0x255   :  { %v468_v38 = vpop.f32.mrf.mxu1 }
 0x256   :  { %v469_v39 = vadd.f32 %v1417_v28, %v468_v38 }
 0x258   :  { %v1717_v40 = vmax.f32 %v469_v39, 0.0 }
 0x259   :  { %1450 = dma.done.wait [#allocation3], 1024 }
 0x25a   :  { %1451 = vsyncadd [#allocation3], 4294966272  ;;  %v1198_v41 = vld [vmem:[%s1955_s1 + $0xc0] sm:$0xff]  ;;  %v1199_v42 = vld [vmem:[%s1955_s1 + $0xc8] sm:$0xff]  ;;  %534 = vrot.lane.b32.xlu0 %v1711_v31, %s1458_s7  ;;  %v522_v49 = vrot.slane %v1711_v31, 1  ;;  %v523_v50 = vrot.slane %v1713_v34, 1  ;;  %538 = vrot.lane.b32.xlu2 %v1715_v37, %s1458_s7 }
 0x25b   :  { %v1200_v43 = vld [vmem:[%s1955_s1 + $0xd0] sm:$0xff]  ;;  %489 = vst [vmem:[#allocation2 + $0x40] sm:$0xff] %v1198_v41  ;;  %v1201_v44 = vld [vmem:[%s1955_s1 + $0xd8] sm:$0xff]  ;;  %v1202_v45 = vld [vmem:[%s1955_s1 + $0xe0] sm:$0xff] }
 0x25c   :  { %491 = vst [vmem:[#allocation2 + $0x20] sm:$0xff] %v1199_v42  ;;  %v1203_v46 = vld [vmem:[%s1955_s1 + $0xe8] sm:$0xff]  ;;  %v1204_v47 = vld [vmem:[%s1955_s1 + $0xf0] sm:$0xff]  ;;  %v1205_v48 = vld [vmem:[%s1955_s1 + $0xf8] sm:$0xff] }
 0x25d   :  { %493 = vst [vmem:[#allocation2 + $0x10] sm:$0xff] %v1200_v43 }
 0x25e   :  { %495 = vst [vmem:[#allocation2 + $0x38] sm:$0xff] %v1201_v44 }
 0x25f   :  { %497 = vst [vmem:[#allocation2 + $0x60] sm:$0xff] %v1202_v45 }
 0x260   :  { %499 = vst [vmem:[#allocation2 + $0x70] sm:$0xff] %v1203_v46 }
 0x261   :  { %501 = vst [vmem:[#allocation2 + $0x78] sm:$0xff] %v1204_v47 }
 0x262   :  { %503 = vst [vmem:[#allocation2 + $0x28] sm:$0xff] %v1205_v48 }
 0x263   :  { %509 = vsyncadd [#allocation3 + $0x1], 1024  ;;  %v524_v51 = vrot.slane %v1715_v37, 1  ;;  %v1370_v52 = vld [vmem:[#allocation2 + $0x48] sm:$0xff]  ;;  %v528_v53 = vsel %vm172_vm4, %v522_v49, %v523_v50  ;;  %536 = vrot.lane.b32.xlu0 %v1713_v34, %s1458_s7  ;;  %540 = vrot.lane.b32.xlu2 %v1717_v40, %s1458_s7  ;;  %v525_v58 = vrot.slane %v1717_v40, 1  ;;  %v1367_v59 = vld [vmem:[#allocation2 + $0x50] sm:$0xff] }
 0x264   :  { %546 = vrot.lane.b32.xlu1 %v528_v53, %s1459_s8  ;;  %629 = vmatpush.bf16.msra.mxu2 %v1370_v52  ;;  %v1369_v54 = vld [vmem:[#allocation2 + $0x8] sm:$0xff]  ;;  %v1366_v63 = vld [vmem:[#allocation2 + $0x18] sm:$0xff]  ;;  %v1364_v1 = vld [vmem:[#allocation2] sm:$0xff]  ;;  %v510_v3 = vrot.slane %v1711_v31, 7  ;;  %v513_v4 = vrot.slane %v1717_v40, 7  ;;  %v511_v7 = vrot.slane %v1713_v34, 7 }
 0x265   :  { %v527_v55 = vsel %vm172_vm4, %v523_v50, %v524_v51  ;;  %v1368_v56 = vld [vmem:[#allocation2 + $0x68] sm:$0xff]  ;;  %v526_v60 = vsel %vm172_vm4, %v524_v51, %v525_v58  ;;  %v529_v61 = vsel %vm172_vm4, %v525_v58, %v522_v49  ;;  %v1365_v0 = vld [vmem:[#allocation2 + $0x58] sm:$0xff]  ;;  %v1363_v2 = vld [vmem:[#allocation2 + $0x30] sm:$0xff]  ;;  %v512_v18 = vrot.slane %v1715_v37, 7 }
 0x266   :  { %v531_v57 = vsel %vm1551_vm2, 0.0, %v527_v55  ;;  %v533_v62 = vsel %vm1555_vm3, 0.0, %v529_v61  ;;  %v517_v6 = vsel %vm159_vm5, %v513_v4, %v510_v3  ;;  %v516_v10 = vsel %vm159_vm5, %v510_v3, %v511_v7  ;;  %v1418_v36 = vld [vmem:[%s1956_s2 + $0x2] ss:$0 sm:$0xff] }
 0x267   :  { %v518_v9 = vsel %vm1543_vm0, 0.0, %v517_v6  ;;  %v515_v25 = vsel %vm159_vm5, %v511_v7, %v512_v18  ;;  %v514_v28 = vsel %vm159_vm5, %v512_v18, %v513_v4 }
 0x268   :  { %630 = vmatpush.bf16.msra.mxu2 %v1369_v54  ;;  %v520_v26 = vsel %vm1547_vm1, 0.0, %v515_v25 }
 0x26b   :  { %550 = vrot.lane.b32.xlu0 %v526_v60, %s1459_s8 }
 0x26c   :  { %548 = vrot.lane.b32.xlu1 %v531_v57, %s1459_s8  ;;  %631 = vmatpush.bf16.msra.mxu2 %v1368_v56 }
 0x270   :  { %632 = vmatpush.bf16.msra.mxu2 %v1367_v59 }
 0x274   :  { %552 = vrot.lane.b32.xlu1 %v533_v62, %s1459_s8  ;;  %633 = vmatpush.bf16.msra.mxu2 %v1366_v63 }
 0x278   :  { %634 = vmatpush.bf16.msra.mxu2 %v1365_v0 }
 0x27c   :  { %635 = vmatpush.bf16.msra.mxu2 %v1364_v1 }
 0x280   :  { %636 = vmatpush.bf16.msra.mxu2 %v1363_v2 }
 0x2b4   :  { %v539_v15 = vpop.permute.xlu2 %538 }
 0x2b5   :  { %v544_v29 = vadd.f32 %v539_v15, %v520_v26 }
 0x2bd   :  { %v541_v27 = vpop.permute.xlu2 %540 }
 0x2be   :  { %v545_v30 = vadd.f32 %v541_v27, %v514_v28 }
 0x2cc   :  { %v535_v5 = vpop.permute.xlu0 %534 }
 0x2cd   :  { %v542_v12 = vadd.f32 %v535_v5, %v518_v9 }
 0x2d5   :  { %v537_v14 = vpop.permute.xlu0 %536 }
 0x2d6   :  { %v547_v8 = vpop.permute.xlu1 %546  ;;  %v543_v11 = vadd.f32 %v537_v14, %v516_v10 }
 0x2d7   :  { %v554_v17 = vadd.f32 %v547_v8, %v542_v12 }
 0x2dd   :  { %v551_v31 = vpop.permute.xlu0 %550 }
 0x2de   :  { %v549_v16 = vpop.permute.xlu1 %548  ;;  %v556_v33 = vadd.f32 %v551_v31, %v544_v29 }
 0x2df   :  { %v555_v19 = vadd.f32 %v549_v16, %v543_v11 }
 0x2e1   :  { %v558_v20 = vpack.c.bf16 %v555_v19, %v554_v17 }
 0x2e3   :  { %637 = vmatmul.bf16.vlgmr.msra.gmra.mxu2 %v558_v20 }
 0x2e6   :  { %v553_v32 = vpop.permute.xlu1 %552 }
 0x2e7   :  { %v557_v34 = vadd.f32 %v553_v32, %v545_v30 }
 0x2e9   :  { %v559_v35 = vpack.c.bf16 %v557_v34, %v556_v33 }
 0x2f3   :  { %642 = vmatmul.bf16.gmra.mxu2 %v559_v35 }
 0x366   :  { %v638_v37 = vpop.f32.mrf.mxu2 }
 0x367   :  { %v639_v38 = vadd.f32 %v1418_v36, %v638_v37 }
 0x369   :  { %v1790_v39 = vmax.f32 %v639_v38, 0.0 }
 0x36e   :  { %v640_v40 = vpop.f32.mrf.mxu2 }
 0x36f   :  { %v641_v41 = vadd.f32 %v1418_v36, %v640_v40 }
 0x371   :  { %v1792_v42 = vmax.f32 %v641_v41, 0.0 }
 0x376   :  { %v643_v43 = vpop.f32.mrf.mxu2 }
 0x377   :  { %v644_v44 = vadd.f32 %v1418_v36, %v643_v43 }
 0x379   :  { %v1794_v45 = vmax.f32 %v644_v44, 0.0 }
 0x37e   :  { %v645_v46 = vpop.f32.mrf.mxu2 }
 0x37f   :  { %v646_v47 = vadd.f32 %v1418_v36, %v645_v46 }
 0x381   :  { %v1796_v48 = vmax.f32 %v646_v47, 0.0 }
 0x382   :  { %1452 = dma.done.wait [#allocation3 + $0x1], 1024 }
 0x383   :  { %1453 = vsyncadd [#allocation3 + $0x1], 4294966272  ;;  %v1239_v49 = vld [vmem:[%s1955_s1 + $0x100] sm:$0xff]  ;;  %v1240_v50 = vld [vmem:[%s1955_s1 + $0x108] sm:$0xff]  ;;  %711 = vrot.lane.b32.xlu0 %v1790_v39, %s1458_s7  ;;  %v699_v57 = vrot.slane %v1790_v39, 1  ;;  %v700_v58 = vrot.slane %v1792_v42, 1  ;;  %715 = vrot.lane.b32.xlu2 %v1794_v45, %s1458_s7 }
 0x384   :  { %v1241_v51 = vld [vmem:[%s1955_s1 + $0x110] sm:$0xff]  ;;  %666 = vst [vmem:[#allocation2 + $0x30] sm:$0xff] %v1239_v49  ;;  %v1242_v52 = vld [vmem:[%s1955_s1 + $0x118] sm:$0xff]  ;;  %v1243_v53 = vld [vmem:[%s1955_s1 + $0x120] sm:$0xff] }
 0x385   :  { %668 = vst [vmem:[#allocation2] sm:$0xff] %v1240_v50  ;;  %v1244_v54 = vld [vmem:[%s1955_s1 + $0x128] sm:$0xff]  ;;  %v1245_v55 = vld [vmem:[%s1955_s1 + $0x130] sm:$0xff]  ;;  %v1246_v56 = vld [vmem:[%s1955_s1 + $0x138] sm:$0xff] }
 0x386   :  { %670 = vst [vmem:[#allocation2 + $0x58] sm:$0xff] %v1241_v51 }
 0x387   :  { %672 = vst [vmem:[#allocation2 + $0x18] sm:$0xff] %v1242_v52 }
 0x388   :  { %674 = vst [vmem:[#allocation2 + $0x50] sm:$0xff] %v1243_v53 }
 0x389   :  { %676 = vst [vmem:[#allocation2 + $0x68] sm:$0xff] %v1244_v54 }
 0x38a   :  { %678 = vst [vmem:[#allocation2 + $0x8] sm:$0xff] %v1245_v55 }
 0x38b   :  { %680 = vst [vmem:[#allocation2 + $0x48] sm:$0xff] %v1246_v56 }
 0x38c   :  { %686 = vsyncadd [#allocation3], 1024  ;;  %v701_v59 = vrot.slane %v1794_v45, 1  ;;  %v1378_v60 = vld [vmem:[#allocation2 + $0x28] sm:$0xff]  ;;  %v705_v61 = vsel %vm172_vm4, %v699_v57, %v700_v58  ;;  %v1377_v62 = vld [vmem:[#allocation2 + $0x78] sm:$0xff]  ;;  %713 = vrot.lane.b32.xlu0 %v1792_v42, %s1458_s7  ;;  %717 = vrot.lane.b32.xlu2 %v1796_v48, %s1458_s7  ;;  %v702_v2 = vrot.slane %v1796_v48, 1 }
 0x38d   :  { %723 = vrot.lane.b32.xlu1 %v705_v61, %s1459_s8  ;;  %806 = vmatpush.bf16.msra.mxu3 %v1378_v60  ;;  %v1376_v0 = vld [vmem:[#allocation2 + $0x70] sm:$0xff]  ;;  %v1375_v3 = vld [vmem:[#allocation2 + $0x60] sm:$0xff]  ;;  %v1374_v7 = vld [vmem:[#allocation2 + $0x38] sm:$0xff]  ;;  %v687_v12 = vrot.slane %v1790_v39, 7  ;;  %v690_v14 = vrot.slane %v1796_v48, 7  ;;  %v688_v16 = vrot.slane %v1792_v42, 7 }
 0x38e   :  { %v704_v63 = vsel %vm172_vm4, %v700_v58, %v701_v59  ;;  %v703_v4 = vsel %vm172_vm4, %v701_v59, %v702_v2  ;;  %v706_v5 = vsel %vm172_vm4, %v702_v2, %v699_v57  ;;  %v1373_v8 = vld [vmem:[#allocation2 + $0x10] sm:$0xff]  ;;  %v1372_v9 = vld [vmem:[#allocation2 + $0x20] sm:$0xff]  ;;  %v689_v30 = vrot.slane %v1794_v45, 7 }
 0x38f   :  { %v708_v1 = vsel %vm1551_vm2, 0.0, %v704_v63  ;;  %v710_v6 = vsel %vm1555_vm3, 0.0, %v706_v5  ;;  %v1371_v10 = vld [vmem:[#allocation2 + $0x40] sm:$0xff]  ;;  %v694_v11 = vsel %vm159_vm5, %v690_v14, %v687_v12  ;;  %v693_v19 = vsel %vm159_vm5, %v687_v12, %v688_v16 }
 0x390   :  { %v695_v18 = vsel %vm1543_vm0, 0.0, %v694_v11  ;;  %v692_v33 = vsel %vm159_vm5, %v688_v16, %v689_v30  ;;  %v691_v36 = vsel %vm159_vm5, %v689_v30, %v690_v14  ;;  %v1419_v44 = vld [vmem:[%s1956_s2 + $0x3] ss:$0 sm:$0xff] }
 0x391   :  { %807 = vmatpush.bf16.msra.mxu3 %v1377_v62  ;;  %v697_v34 = vsel %vm1547_vm1, 0.0, %v692_v33 }
 0x394   :  { %727 = vrot.lane.b32.xlu0 %v703_v4, %s1459_s8 }
 0x395   :  { %725 = vrot.lane.b32.xlu1 %v708_v1, %s1459_s8  ;;  %808 = vmatpush.bf16.msra.mxu3 %v1376_v0 }
 0x399   :  { %809 = vmatpush.bf16.msra.mxu3 %v1375_v3 }
 0x39d   :  { %729 = vrot.lane.b32.xlu1 %v710_v6, %s1459_s8  ;;  %810 = vmatpush.bf16.msra.mxu3 %v1374_v7 }
 0x3a1   :  { %811 = vmatpush.bf16.msra.mxu3 %v1373_v8 }
 0x3a5   :  { %812 = vmatpush.bf16.msra.mxu3 %v1372_v9 }
 0x3a9   :  { %813 = vmatpush.bf16.msra.mxu3 %v1371_v10 }
 0x3dd   :  { %v716_v26 = vpop.permute.xlu2 %715 }
 0x3de   :  { %v721_v37 = vadd.f32 %v716_v26, %v697_v34 }
 0x3e6   :  { %v718_v35 = vpop.permute.xlu2 %717 }
 0x3e7   :  { %v722_v38 = vadd.f32 %v718_v35, %v691_v36 }
 0x3f5   :  { %v712_v15 = vpop.permute.xlu0 %711 }
 0x3f6   :  { %v719_v20 = vadd.f32 %v712_v15, %v695_v18 }
 0x3fe   :  { %v714_v25 = vpop.permute.xlu0 %713 }
 0x3ff   :  { %v724_v17 = vpop.permute.xlu1 %723  ;;  %v720_v27 = vadd.f32 %v714_v25, %v693_v19 }
 0x400   :  { %v731_v29 = vadd.f32 %v724_v17, %v719_v20 }
 0x406   :  { %v728_v39 = vpop.permute.xlu0 %727 }
 0x407   :  { %v726_v28 = vpop.permute.xlu1 %725  ;;  %v733_v41 = vadd.f32 %v728_v39, %v721_v37 }
 0x408   :  { %v732_v31 = vadd.f32 %v726_v28, %v720_v27 }
 0x40a   :  { %v735_v32 = vpack.c.bf16 %v732_v31, %v731_v29 }
 0x40c   :  { %814 = vmatmul.bf16.vlgmr.msra.gmra.mxu3 %v735_v32 }
 0x40f   :  { %v730_v40 = vpop.permute.xlu1 %729 }
 0x410   :  { %v734_v42 = vadd.f32 %v730_v40, %v722_v38 }
 0x412   :  { %v736_v43 = vpack.c.bf16 %v734_v42, %v733_v41 }
 0x41c   :  { %819 = vmatmul.bf16.gmra.mxu3 %v736_v43 }
 0x48f   :  { %v815_v45 = vpop.f32.mrf.mxu3 }
 0x490   :  { %v816_v46 = vadd.f32 %v1419_v44, %v815_v45 }
 0x492   :  { %v1869_v47 = vmax.f32 %v816_v46, 0.0 }
 0x494   :  { %855 = vrot.lane.b32.xlu2 %v1869_v47, %s1458_s7 }
 0x497   :  { %v817_v48 = vpop.f32.mrf.mxu3 }
 0x498   :  { %v818_v49 = vadd.f32 %v1419_v44, %v817_v48 }
 0x49a   :  { %v1871_v50 = vmax.f32 %v818_v49, 0.0 }
 0x49f   :  { %v820_v51 = vpop.f32.mrf.mxu3 }
 0x4a0   :  { %v821_v52 = vadd.f32 %v1419_v44, %v820_v51 }
 0x4a2   :  { %v1873_v53 = vmax.f32 %v821_v52, 0.0 }
 0x4a4   :  { %859 = vrot.lane.b32.xlu0 %v1873_v53, %s1458_s7  ;;  %v845_v57 = vrot.slane %v1873_v53, 1 }
 0x4a7   :  { %v822_v54 = vpop.f32.mrf.mxu3 }
 0x4a8   :  { %v823_v55 = vadd.f32 %v1419_v44, %v822_v54 }
 0x4aa   :  { %v1875_v56 = vmax.f32 %v823_v55, 0.0 }
 0x4ac   :  { %v846_v58 = vrot.slane %v1875_v56, 1 }
 0x4ad   :  { %1454 = dma.done.wait [#allocation3], 1024 }
 0x4ae   :  { %1455 = vsyncadd [#allocation3], 4294966272  ;;  %v843_v59 = vrot.slane %v1869_v47, 1  ;;  %v847_v60 = vsel %vm172_vm4, %v845_v57, %v846_v58  ;;  %v1386_v62 = vld [vmem:[#allocation2 + $0x48] sm:$0xff]  ;;  %861 = vrot.lane.b32.xlu0 %v1875_v56, %s1458_s7  ;;  %857 = vrot.lane.b32.xlu2 %v1871_v50, %s1458_s7  ;;  %v844_v0 = vrot.slane %v1871_v50, 1  ;;  %v1383_v5 = vld [vmem:[#allocation2 + $0x50] sm:$0xff] }
 0x4af   :  { %871 = vrot.lane.b32.xlu1 %v847_v60, %s1459_s8  ;;  %1395 = vmatpush.bf16.msrb.mxu2 %v1386_v62  ;;  %v1385_v1 = vld [vmem:[#allocation2 + $0x8] sm:$0xff]  ;;  %v1382_v6 = vld [vmem:[#allocation2 + $0x18] sm:$0xff]  ;;  %v1380_v8 = vld [vmem:[#allocation2] sm:$0xff]  ;;  %v832_v12 = vrot.slane %v1871_v50, 7  ;;  %v833_v14 = vrot.slane %v1873_v53, 7  ;;  %v834_v17 = vrot.slane %v1875_v56, 7 }
 0x4b0   :  { %v850_v61 = vsel %vm172_vm4, %v846_v58, %v843_v59  ;;  %950 = vmatpush.bf16.msrb.mxu0 %v1386_v62  ;;  %v849_v2 = vsel %vm172_vm4, %v843_v59, %v844_v0  ;;  %v848_v3 = vsel %vm172_vm4, %v844_v0, %v845_v57  ;;  %v1384_v4 = vld [vmem:[#allocation2 + $0x68] sm:$0xff]  ;;  %v1381_v7 = vld [vmem:[#allocation2 + $0x58] sm:$0xff]  ;;  %v1379_v9 = vld [vmem:[#allocation2 + $0x30] sm:$0xff]  ;;  %v831_v27 = vrot.slane %v1869_v47, 7  ;;  %s1072_s12 = sshll.u32 %s1959_s5, 4  ;;  %s1462_s13 = smov 8   ;;  %s1073_s12 = int_to_ptr.hbm [resolvable:$true] %s1072_s12 }
 0x4b1   :  { %v854_v63 = vsel %vm1555_vm3, 0.0, %v850_v61  ;;  %v852_v24 = vsel %vm1551_vm2, 0.0, %v848_v3  ;;  %v1394_v23 = vld [vmem:[%s1957_s3 + $0x38] sm:$0xff]  ;;  %v1393_v10 = vld [vmem:[%s1957_s3 + $0x30] sm:$0xff]  ;;  %v1392_v15 = vld [vmem:[%s1957_s3 + $0x28] sm:$0xff]  ;;  %v836_v16 = vsel %vm159_vm5, %v832_v12, %v833_v14  ;;  %v835_v26 = vsel %vm159_vm5, %v833_v14, %v834_v17 }
 0x4b2   :  { %1403 = vmatpush.bf16.msrb.mxu3 %v1394_v23  ;;  %1043 = vmatpush.bf16.msrb.mxu1 %v1394_v23  ;;  %v1391_v18 = vld [vmem:[%s1957_s3 + $0x20] sm:$0xff]  ;;  %v841_v25 = vsel %vm1547_vm1, 0.0, %v836_v16  ;;  %v838_v31 = vsel %vm159_vm5, %v834_v17, %v831_v27  ;;  %v837_v36 = vsel %vm159_vm5, %v831_v27, %v832_v12  ;;  %v1390_v45 = vld [vmem:[%s1957_s3 + $0x18] sm:$0xff]  ;;  %v1389_v13 = vld [vmem:[%s1957_s3 + $0x10] sm:$0xff] }
 0x4b3   :  { %1396 = vmatpush.bf16.msrb.mxu2 %v1385_v1  ;;  %v839_v22 = vsel %vm1543_vm0, 0.0, %v838_v31  ;;  %v1388_v21 = vld [vmem:[%s1957_s3 + $0x8] sm:$0xff]  ;;  %v1387_v46 = vld [vmem:[%s1957_s3] sm:$0xff] }
 0x4b4   :  { %951 = vmatpush.bf16.msrb.mxu0 %v1385_v1  ;;  %v1420_v49 = vld [vmem:[%s1956_s2 + $0x4] ss:$0 sm:$0xff]  ;;  %v1421_v62 = vld [vmem:[%s1958_s4] ss:$0 sm:$0xff]  ;;  %s1460_s2 = smov [#allocation4]   ;;  %s1461_s4 = smov 128  }
 0x4b5   :  { %s1070_s9 = sshll.u32 %s1460_s2, 4  ;;  %s1071_s9 = int_to_ptr.vmem [resolvable:$true] %s1070_s9 }
 0x4b6   :  { %867 = vrot.lane.b32.xlu0 %v849_v2, %s1459_s8  ;;  %1404 = vmatpush.bf16.msrb.mxu3 %v1393_v10 }
 0x4b7   :  { %873 = vrot.lane.b32.xlu1 %v854_v63, %s1459_s8  ;;  %1397 = vmatpush.bf16.msrb.mxu2 %v1384_v4 }
 0x4b8   :  { %952 = vmatpush.bf16.msrb.mxu0 %v1384_v4  ;;  %1044 = vmatpush.bf16.msrb.mxu1 %v1393_v10 }
 0x4ba   :  { %1405 = vmatpush.bf16.msrb.mxu3 %v1392_v15 }
 0x4bb   :  { %1398 = vmatpush.bf16.msrb.mxu2 %v1383_v5 }
 0x4bc   :  { %953 = vmatpush.bf16.msrb.mxu0 %v1383_v5  ;;  %1045 = vmatpush.bf16.msrb.mxu1 %v1392_v15 }
 0x4be   :  { %1406 = vmatpush.bf16.msrb.mxu3 %v1391_v18 }
 0x4bf   :  { %869 = vrot.lane.b32.xlu1 %v852_v24, %s1459_s8  ;;  %1399 = vmatpush.bf16.msrb.mxu2 %v1382_v6 }
 0x4c0   :  { %954 = vmatpush.bf16.msrb.mxu0 %v1382_v6  ;;  %1046 = vmatpush.bf16.msrb.mxu1 %v1391_v18 }
 0x4c2   :  { %1407 = vmatpush.bf16.msrb.mxu3 %v1390_v45 }
 0x4c3   :  { %1400 = vmatpush.bf16.msrb.mxu2 %v1381_v7 }
 0x4c4   :  { %955 = vmatpush.bf16.msrb.mxu0 %v1381_v7  ;;  %1047 = vmatpush.bf16.msrb.mxu1 %v1390_v45 }
 0x4c6   :  { %1408 = vmatpush.bf16.msrb.mxu3 %v1389_v13 }
 0x4c7   :  { %1401 = vmatpush.bf16.msrb.mxu2 %v1380_v8 }
 0x4c8   :  { %956 = vmatpush.bf16.msrb.mxu0 %v1380_v8  ;;  %1048 = vmatpush.bf16.msrb.mxu1 %v1389_v13 }
 0x4ca   :  { %1409 = vmatpush.bf16.msrb.mxu3 %v1388_v21 }
 0x4cb   :  { %1402 = vmatpush.bf16.msrb.mxu2 %v1379_v9 }
 0x4cc   :  { %957 = vmatpush.bf16.msrb.mxu0 %v1379_v9  ;;  %1049 = vmatpush.bf16.msrb.mxu1 %v1388_v21 }
 0x4ce   :  { %1410 = vmatpush.bf16.msrb.mxu3 %v1387_v46 }
 0x4d0   :  { %1050 = vmatpush.bf16.msrb.mxu1 %v1387_v46 }
 0x4ee   :  { %v856_v20 = vpop.permute.xlu2 %855 }
 0x4ef   :  { %v863_v38 = vadd.f32 %v856_v20, %v839_v22 }
 0x508   :  { %v858_v35 = vpop.permute.xlu2 %857 }
 0x509   :  { %v864_v39 = vadd.f32 %v858_v35, %v837_v36 }
 0x516   :  { %v860_v11 = vpop.permute.xlu0 %859 }
 0x517   :  { %v865_v28 = vadd.f32 %v860_v11, %v841_v25 }
 0x520   :  { %v862_v29 = vpop.permute.xlu0 %861 }
 0x521   :  { %v872_v19 = vpop.permute.xlu1 %871  ;;  %v866_v30 = vadd.f32 %v862_v29, %v835_v26 }
 0x522   :  { %v877_v33 = vadd.f32 %v872_v19, %v865_v28 }
 0x528   :  { %v868_v40 = vpop.permute.xlu0 %867 }
 0x529   :  { %v874_v32 = vpop.permute.xlu1 %873  ;;  %v875_v42 = vadd.f32 %v868_v40, %v863_v38 }
 0x52a   :  { %v878_v34 = vadd.f32 %v874_v32, %v866_v30 }
 0x52c   :  { %v880_v37 = vpack.c.bf16 %v878_v34, %v877_v33 }
 0x52e   :  { %963 = vmatmul.bf16.vlgmr.msrb.gmra.mxu2 %v880_v37 }
 0x531   :  { %v870_v41 = vpop.permute.xlu1 %869 }
 0x532   :  { %v876_v43 = vadd.f32 %v870_v41, %v864_v39 }
 0x534   :  { %v879_v44 = vpack.c.bf16 %v876_v43, %v875_v42 }
 0x536   :  { %958 = vmatmul.bf16.vlgmr.msrb.gmra.mxu0 %v879_v44 }
 0x5b1   :  { %v964_v47 = vpop.f32.mrf.mxu2 }
 0x5b2   :  { %v965_v50 = vadd.f32 %v1420_v49, %v964_v47 }
 0x5b3   :  { %v959_v48 = vpop.f32.mrf.mxu0 }
 0x5b4   :  { %v960_v52 = vadd.f32 %v1420_v49, %v959_v48  ;;  %v971_v55 = vmax.f32 %v965_v50, 0.0 }
 0x5b6   :  { %v969_v58 = vmax.f32 %v960_v52, 0.0 }
 0x5b9   :  { %v966_v51 = vpop.f32.mrf.mxu2 }
 0x5ba   :  { %v967_v53 = vadd.f32 %v1420_v49, %v966_v51 }
 0x5bb   :  { %v961_v54 = vpop.f32.mrf.mxu0 }
 0x5bc   :  { %v972_v56 = vmax.f32 %v967_v53, 0.0  ;;  %v962_v57 = vadd.f32 %v1420_v49, %v961_v54 }
 0x5be   :  { %v970_v59 = vmax.f32 %v962_v57, 0.0  ;;  %v974_v60 = vpack.c.bf16 %v972_v56, %v971_v55 }
 0x5c0   :  { %1056 = vmatmul.bf16.vlgmr.msrb.gmra.mxu3 %v974_v60  ;;  %v973_v61 = vpack.c.bf16 %v970_v59, %v969_v58 }
 0x5c2   :  { %1051 = vmatmul.bf16.vlgmr.msrb.gmra.mxu1 %v973_v61 }
 0x63f   :  { %v1052_v63 = vpop.f32.mrf.mxu1 }
 0x640   :  { %v1053_v0 = vadd.f32 %v1421_v62, %v1052_v63 }
 0x642   :  { %1062 = vst [vmem:[#allocation4] sm:$0xff] %v1053_v0 }
 0x643   :  { %v1057_v1 = vpop.f32.mrf.mxu3 }
 0x644   :  { %v1058_v2 = vadd.f32 %v1421_v62, %v1057_v1 }
 0x646   :  { %1064 = vst [vmem:[#allocation4 + $0x10] sm:$0xff] %v1058_v2 }
 0x647   :  { %v1054_v3 = vpop.f32.mrf.mxu1 }
 0x648   :  { %v1055_v4 = vadd.f32 %v1421_v62, %v1054_v3 }
 0x64a   :  { %1063 = vst [vmem:[#allocation4 + $0x8] sm:$0xff] %v1055_v4 }
 0x64b   :  { %v1059_v24 = vpop.f32.mrf.mxu3 }
 0x64c   :  { %v1060_v5 = vadd.f32 %v1421_v62, %v1059_v24 }
 0x64e   :  { %1065 = vst [vmem:[#allocation4 + $0x18] sm:$0xff] %v1060_v5 }
 0x64f   :  { %1078 = dma.vmem_to_hbm [thread:$0]  %s1071_s9, 512, %s1073_s12, [#allocation5], %s1461_s4, %s1461_s4, %s1462_s13  }
 0x650   :  { %1456 = dma.done.wait [#allocation5], 512  }
 0x651   :  { %1457 = vsyncadd [#allocation5], 4294966784 }
 0x652   :  { %1083 = vsyncpa [#allocation5], 1 }
 0x653   :  { %1084 = vsyncmov [#allocation3] }
 0x656   :  { %s1085_s14 = vpop.sfrf %1084 }
 0x657   :  { %p1345_p0 = scmp.ne.s32.totalorder %s1085_s14, 0 }
 0x659   :  { %1089 = shalt.err (%p1345_p0)  }
 0x65a   :  { %1091 = vsyncmov [#allocation3 + $0x1] }
 0x65d   :  { %s1092_s1 = vpop.sfrf %1091 }
 0x65e   :  { %p1346_p1 = scmp.ne.s32.totalorder %s1092_s1, 0 }
 0x660   :  { %1096 = shalt.err (%p1346_p1)  }

</bundles_post_ra>
